<compile_context>
chip_gen: v7x
topology: tpu7x:2x2x1
jax: 0.10.0
libtpu: 0.0.40
codegen_flags: <defaults>
</compile_context>

<pallas_src>
import functools

import numpy as np
import jax
import jax.numpy as jnp
from jax import lax
from jax.experimental import pallas as pl
from jax.experimental.pallas import tpu as pltpu


_PER_TAP_MIN_C = 128   # conv strategy switch: im2col below, per-tap matmuls at/above


def _zero_pad_hw(x):
    """x: (Hp, Wp, C) -> (Hp+2, Wp+2, C) with a 1-pixel zero border (value-level)."""
    Hp, Wp, C = x.shape
    zrow = jnp.zeros((1, Wp, C), x.dtype)
    x = jnp.concatenate([zrow, x, zrow], axis=0)      # H pad: major dim, cheap
    zcol = jnp.zeros((Hp + 2, 1, C), x.dtype)
    return jnp.concatenate([zcol, x, zcol], axis=1)   # W pad: sublane dim


def _maxpool_2x2(xv, Cin):
    """xv: (Hp, 2, Wp, 2*Cin) bf16 -> (Hp, Wp, Cin) bf16 (2x2 max pool)."""
    hmax = jnp.maximum(xv[:, 0], xv[:, 1])            # h-parity max: (Hp, Wp, 2*Cin)
    if Cin % 128 == 0:
        # Both halves are 128-lane aligned: the slices are free.
        return jnp.maximum(hmax[:, :, :Cin], hmax[:, :, Cin:])
    if Cin % 64 == 0:
        # Lane width (2*Cin) is vreg aligned but the split point is not: ride the
        # XLU with a half-width lane rotation, then the offset-0 slice is free.
        swapped = pltpu.roll(hmax, shift=Cin, axis=-1)
        return jnp.maximum(hmax, swapped)[:, :, :Cin]
    # Small / odd channel counts (sub-vreg lane dim): the shifted slice is a single
    # in-vreg lane shift; keep it simple (this path is what the tiny test exercises).
    return jnp.maximum(hmax[:, :, :Cin], hmax[:, :, Cin:])


def _conv3x3(pad, w9, Hp, Wp):
    """3x3 'same' conv on a zero-padded activation.

    pad: (Hp+2, Wp+2, C) bf16
    w9:  (9, C, Cout)    bf16, tap index = dy*3 + dx
    returns (Hp*Wp, Cout) f32.  No bias: it is cancelled by the following IN.
    """
    C = pad.shape[-1]
    Cout = w9.shape[-1]
    if C < _PER_TAP_MIN_C:
        # im2col: one (Hp*Wp, 9C) x (9C, Cout) MXU matmul; patch buffer is small here.
        cols = [pad[dy:dy + Hp, dx:dx + Wp, :] for dy in range(3) for dx in range(3)]
        patches = jnp.concatenate(cols, axis=-1).reshape(Hp * Wp, 9 * C)
        return jnp.dot(patches, w9.reshape(9 * C, Cout),
                       preferred_element_type=jnp.float32)
    # Per-tap accumulating matmuls: no 9x patch buffer; K=C >= 128 still fills the MXU.
    acc = jnp.zeros((Hp * Wp, Cout), jnp.float32)
    for tap in range(9):
        dy, dx = divmod(tap, 3)
        lhs = pad[dy:dy + Hp, dx:dx + Wp, :].reshape(Hp * Wp, C)
        acc = acc + jnp.dot(lhs, w9[tap], preferred_element_type=jnp.float32)
    return acc


def _instancenorm_lrelu(acc, eps=1e-5, slope=0.01):
    """Per-instance, per-channel InstanceNorm (affine=False, biased two-pass var)
    followed by LeakyReLU(0.01).  acc: (Hp*Wp, Cout) f32."""
    mean = jnp.mean(acc, axis=0, keepdims=True)
    centered = acc - mean
    var = jnp.mean(centered * centered, axis=0, keepdims=True)
    y = centered * lax.rsqrt(var + eps)
    return jnp.where(y > 0, y, slope * y)


def unet_down_kernel(x_ref, w1_ref, w2_ref, o_ref, *, Hp, Wp, Cin, Cout,
                     store_channels_major):
    # x_ref block: (1, Hp, 2, Wp, 2*Cin) bf16
    pooled = _maxpool_2x2(x_ref[0], Cin)                          # (Hp, Wp, Cin) bf16

    # Conv1 -> InstanceNorm -> LeakyReLU
    y = _instancenorm_lrelu(
        _conv3x3(_zero_pad_hw(pooled), w1_ref[...], Hp, Wp))      # (Hp*Wp, Cout) f32

    # Conv2 -> InstanceNorm -> LeakyReLU
    pad2 = _zero_pad_hw(y.reshape(Hp, Wp, Cout).astype(jnp.bfloat16))
    z = _instancenorm_lrelu(_conv3x3(pad2, w2_ref[...], Hp, Wp))  # (Hp*Wp, Cout) f32

    if store_channels_major:
        # Small Cout: (Cout, Hp*Wp) keeps the store lane-dense (spatial on lanes).
        o_ref[0] = jnp.transpose(z).astype(o_ref.dtype)
    else:
        # Cout is 128-aligned: both layouts store full lanes, so skip the in-kernel
        # XLU transpose and let the wrapper do the NCHW permute.
        o_ref[0] = z.astype(o_ref.dtype)


def _vmem_limit_bytes(Hp, Wp, Cin, Cout, out_itemsize):
    """Rough per-step VMEM working set (double-buffered I/O + kernel temporaries)."""
    hw = Hp * Wp
    in_blk = Hp * 2 * Wp * 2 * Cin * 2                       # bf16 input block
    out_blk = hw * Cout * out_itemsize
    weights = (9 * Cin * Cout + 9 * Cout * Cout) * 2         # bf16 weights
    pads = (Hp + 2) * (Wp + 2) * (Cin + Cout) * 2            # bf16 padded activations
    patch1 = 0 if Cin >= _PER_TAP_MIN_C else hw * 9 * Cin * 2
    patch2 = 0 if Cout >= _PER_TAP_MIN_C else hw * 9 * Cout * 2
    accs = 2 * hw * Cout * 4                                 # f32 conv acc + normalized
    est = 2 * (in_blk + out_blk + weights) + pads + max(patch1, patch2) + accs
    est = int(est * 1.25)                                    # compiler scratch headroom
    return min(96 * 1024 * 1024, max(16 * 1024 * 1024, est))


def unet_down(x_nchw, w1, b1, w2, b2, *, out_dtype=jnp.bfloat16):
    """UNetDown forward.  x_nchw: (N, Cin, H, W); w1: (Cout, Cin, 3, 3);
    w2: (Cout, Cout, 3, 3).  b1/b2 are accepted for API parity but a per-channel
    bias before InstanceNorm(affine=False) is exactly cancelled by the mean
    subtraction, so they are never DMA'd or added (dead compute removed)."""
    del b1, b2
    N, Cin, H, W = x_nchw.shape
    Cout = w1.shape[0]
    assert H % 2 == 0 and W % 2 == 0, "UNetDown kernel assumes even H and W"
    Hp, Wp = H // 2, W // 2

    # NCHW -> NHWC (bf16) -> (N, Hp, 2, Wp, 2*Cin): a pure row-major regroup so the
    # in-kernel 2x2 pool needs no strided loads.  bf16 DMA is safe: max is monotone,
    # so max-then-cast == cast-then-max, and the conv operands are bf16 anyway.
    x5 = (jnp.transpose(x_nchw, (0, 2, 3, 1))
          .astype(jnp.bfloat16)
          .reshape(N, Hp, 2, Wp, 2 * Cin))

    # OIHW -> (tap = ky*3 + kx, Cin, Cout) bf16.  In-kernel: reshaped to (9C, Cout)
    # for the im2col path or indexed per tap for the per-tap path.
    w1m = jnp.transpose(w1, (2, 3, 1, 0)).reshape(9, Cin, Cout).astype(jnp.bfloat16)
    w2m = jnp.transpose(w2, (2, 3, 1, 0)).reshape(9, Cout, Cout).astype(jnp.bfloat16)

    store_channels_major = (Cout % 128 != 0)
    # TODO(synk): for production nets, pad Cout to a multiple of 128 (zero weight
    # columns) in this wrapper so the MXU N-dim and all lane ops run fully occupied.
    out_block = (1, Cout, Hp * Wp) if store_channels_major else (1, Hp * Wp, Cout)
    out_shape = jax.ShapeDtypeStruct((N,) + out_block[1:], out_dtype)

    kernel = functools.partial(unet_down_kernel, Hp=Hp, Wp=Wp, Cin=Cin, Cout=Cout,
                               store_channels_major=store_channels_major)
    out = pl.pallas_call(
        kernel,
        out_shape=out_shape,
        grid=(N,),
        in_specs=[
            pl.BlockSpec((1, Hp, 2, Wp, 2 * Cin), lambda n: (n, 0, 0, 0, 0)),
            pl.BlockSpec((9, Cin, Cout), lambda n: (0, 0, 0)),
            pl.BlockSpec((9, Cout, Cout), lambda n: (0, 0, 0)),
        ],
        out_specs=pl.BlockSpec(out_block, lambda n: (n, 0, 0)),
        compiler_params=pltpu.CompilerParams(
            dimension_semantics=("parallel",),   # batch elements are independent
            vmem_limit_bytes=_vmem_limit_bytes(
                Hp, Wp, Cin, Cout, np.dtype(out_dtype).itemsize),
        ),
    )(x5, w1m, w2m)

    if store_channels_major:
        return out.reshape(N, Cout, Hp, Wp)       # already NCHW; free reshape
    # 128-aligned Cout: NCHW permute happens here, off the kernel's serial tail.
    return jnp.transpose(out.reshape(N, Hp, Wp, Cout), (0, 3, 1, 2))


def unet_down_ref(x, w1, b1, w2, b2):
    """Pure-JAX f32 NCHW reference mirroring the PyTorch module exactly."""
    p = lax.reduce_window(x, -jnp.inf, lax.max, (1, 1, 2, 2), (1, 1, 2, 2), "VALID")

    def conv(inp, w, b):
        y = lax.conv_general_dilated(inp, w, (1, 1), ((1, 1), (1, 1)),
                                     dimension_numbers=("NCHW", "OIHW", "NCHW"))
        return y + b.reshape(1, -1, 1, 1)

    def inorm(y, eps=1e-5):
        m = y.mean(axis=(2, 3), keepdims=True)
        v = ((y - m) ** 2).mean(axis=(2, 3), keepdims=True)
        return (y - m) / jnp.sqrt(v + eps)

    def lrelu(y):
        return jnp.where(y > 0, y, 0.01 * y)

    y = lrelu(inorm(conv(p, w1, b1)))
    return lrelu(inorm(conv(y, w2, b2)))


if __name__ == "__main__":
    key = jax.random.PRNGKey(0)
    N, Cin, Cout, H, W = 2, 4, 8, 16, 16
    kx, k1, kb1, k2, kb2 = jax.random.split(key, 5)

    x = jax.random.normal(kx, (N, Cin, H, W), jnp.float32)

    # Deterministic parameter init (Kaiming-uniform-like bounds, as in nn.Conv2d).
    fan1 = Cin * 3 * 3
    w1 = jax.random.uniform(k1, (Cout, Cin, 3, 3), jnp.float32, -1.0, 1.0) / jnp.sqrt(fan1)
    b1 = jax.random.uniform(kb1, (Cout,), jnp.float32, -1.0, 1.0) / jnp.sqrt(fan1)
    fan2 = Cout * 3 * 3
    w2 = jax.random.uniform(k2, (Cout, Cout, 3, 3), jnp.float32, -1.0, 1.0) / jnp.sqrt(fan2)
    b2 = jax.random.uniform(kb2, (Cout,), jnp.float32, -1.0, 1.0) / jnp.sqrt(fan2)

    out = jax.block_until_ready(unet_down(x, w1, b1, w2, b2))
    assert out.shape == (N, Cout, H // 2, W // 2), out.shape
    assert out.dtype == jnp.bfloat16, out.dtype

    ref = unet_down_ref(x, w1, b1, w2, b2)
    # bf16 MXU operands / bf16 output (f32 accumulation & stats) vs f32 reference.
    np.testing.assert_allclose(np.asarray(out.astype(jnp.float32)), np.asarray(ref),
                               atol=5e-2, rtol=5e-2)

    print("KERNEL_OK")
</pallas_src>

<mosaic_0001>
module attributes {stable_mosaic.version = 11 : i64} {
  func.func @unet_down_kernel(%arg0: i32, %arg1: memref<1x8x2x8x8xbf16, #tpu.memory_space<vmem>>, %arg2: memref<9x4x8xbf16, #tpu.memory_space<vmem>>, %arg3: memref<9x8x8xbf16, #tpu.memory_space<vmem>>, %arg4: memref<1x8x64xbf16, #tpu.memory_space<vmem>>) attributes {dimension_semantics = [#tpu.dimension_semantics<parallel>], iteration_bounds = array<i64: 2>, scalar_prefetch = 0 : i64, scratch_operands = 0 : i64, tpu.core_type = #tpu.core_type<tc>, window_params = [{transform_indices = @transform_0, window_bounds = array<i64: 1, 8, 2, 8, 8>}, {pipeline_mode = #tpu.pipeline_mode<synchronous>, transform_indices = @transform_1, window_bounds = array<i64: 9, 4, 8>}, {pipeline_mode = #tpu.pipeline_mode<synchronous>, transform_indices = @transform_2, window_bounds = array<i64: 9, 8, 8>}, {transform_indices = @transform_3, window_bounds = array<i64: 1, 8, 64>}]} {
    %c0 = arith.constant 0 : index
    %c0_0 = arith.constant 0 : index
    %c0_1 = arith.constant 0 : index
    %c0_2 = arith.constant 0 : index
    %c0_3 = arith.constant 0 : index
    %0 = vector.load %arg1[%c0, %c0_0, %c0_1, %c0_2, %c0_3] : memref<1x8x2x8x8xbf16, #tpu.memory_space<vmem>>, vector<1x8x2x8x8xbf16>
    %1 = vector.shape_cast %0 : vector<1x8x2x8x8xbf16> to vector<8x2x8x8xbf16>
    %2 = vector.extract_strided_slice %1 {offsets = [0, 0, 0, 0], sizes = [8, 1, 8, 8], strides = [1, 1, 1, 1]} : vector<8x2x8x8xbf16> to vector<8x1x8x8xbf16>
    %3 = vector.shape_cast %2 : vector<8x1x8x8xbf16> to vector<8x8x8xbf16>
    %4 = vector.extract_strided_slice %1 {offsets = [0, 1, 0, 0], sizes = [8, 1, 8, 8], strides = [1, 1, 1, 1]} : vector<8x2x8x8xbf16> to vector<8x1x8x8xbf16>
    %5 = vector.shape_cast %4 : vector<8x1x8x8xbf16> to vector<8x8x8xbf16>
    %6 = arith.maximumf %3, %5 : vector<8x8x8xbf16>
    %7 = vector.extract_strided_slice %6 {offsets = [0, 0, 0], sizes = [8, 8, 4], strides = [1, 1, 1]} : vector<8x8x8xbf16> to vector<8x8x4xbf16>
    %8 = vector.extract_strided_slice %6 {offsets = [0, 0, 4], sizes = [8, 8, 4], strides = [1, 1, 1]} : vector<8x8x8xbf16> to vector<8x8x4xbf16>
    %9 = arith.maximumf %7, %8 : vector<8x8x4xbf16>
    %cst = arith.constant 0.000000e+00 : bf16
    %10 = vector.broadcast %cst : bf16 to vector<1x8x4xbf16>
    %11 = tpu.concatenate %10, %9, %10 in 0 : vector<1x8x4xbf16>, vector<8x8x4xbf16>, vector<1x8x4xbf16> -> vector<10x8x4xbf16>
    %cst_4 = arith.constant 0.000000e+00 : bf16
    %12 = vector.broadcast %cst_4 : bf16 to vector<10x1x4xbf16>
    %13 = tpu.concatenate %12, %11, %12 in 1 : vector<10x1x4xbf16>, vector<10x8x4xbf16>, vector<10x1x4xbf16> -> vector<10x10x4xbf16>
    %c0_5 = arith.constant 0 : index
    %c0_6 = arith.constant 0 : index
    %c0_7 = arith.constant 0 : index
    %14 = vector.load %arg2[%c0_5, %c0_6, %c0_7] : memref<9x4x8xbf16, #tpu.memory_space<vmem>>, vector<9x4x8xbf16>
    %15 = vector.extract_strided_slice %13 {offsets = [0, 0, 0], sizes = [8, 8, 4], strides = [1, 1, 1]} : vector<10x10x4xbf16> to vector<8x8x4xbf16>
    %16 = vector.extract_strided_slice %13 {offsets = [0, 1, 0], sizes = [8, 8, 4], strides = [1, 1, 1]} : vector<10x10x4xbf16> to vector<8x8x4xbf16>
    %17 = vector.extract_strided_slice %13 {offsets = [0, 2, 0], sizes = [8, 8, 4], strides = [1, 1, 1]} : vector<10x10x4xbf16> to vector<8x8x4xbf16>
    %18 = vector.extract_strided_slice %13 {offsets = [1, 0, 0], sizes = [8, 8, 4], strides = [1, 1, 1]} : vector<10x10x4xbf16> to vector<8x8x4xbf16>
    %19 = vector.extract_strided_slice %13 {offsets = [1, 1, 0], sizes = [8, 8, 4], strides = [1, 1, 1]} : vector<10x10x4xbf16> to vector<8x8x4xbf16>
    %20 = vector.extract_strided_slice %13 {offsets = [1, 2, 0], sizes = [8, 8, 4], strides = [1, 1, 1]} : vector<10x10x4xbf16> to vector<8x8x4xbf16>
    %21 = vector.extract_strided_slice %13 {offsets = [2, 0, 0], sizes = [8, 8, 4], strides = [1, 1, 1]} : vector<10x10x4xbf16> to vector<8x8x4xbf16>
    %22 = vector.extract_strided_slice %13 {offsets = [2, 1, 0], sizes = [8, 8, 4], strides = [1, 1, 1]} : vector<10x10x4xbf16> to vector<8x8x4xbf16>
    %23 = vector.extract_strided_slice %13 {offsets = [2, 2, 0], sizes = [8, 8, 4], strides = [1, 1, 1]} : vector<10x10x4xbf16> to vector<8x8x4xbf16>
    %24 = tpu.concatenate %15, %16, %17, %18, %19, %20, %21, %22, %23 in 2 : vector<8x8x4xbf16>, vector<8x8x4xbf16>, vector<8x8x4xbf16>, vector<8x8x4xbf16>, vector<8x8x4xbf16>, vector<8x8x4xbf16>, vector<8x8x4xbf16>, vector<8x8x4xbf16>, vector<8x8x4xbf16> -> vector<8x8x36xbf16>
    %25 = vector.shape_cast %24 : vector<8x8x36xbf16> to vector<64x36xbf16>
    %26 = vector.shape_cast %14 : vector<9x4x8xbf16> to vector<36x8xbf16>
    %cst_8 = arith.constant dense<0.000000e+00> : vector<64x8xf32>
    %27 = tpu.matmul %25, %26, %cst_8 {dimension_numbers = #tpu.dot_dimension_numbers<[1], [0], [0], [1], [0, 0, 1, 1], [], []>} : vector<64x36xbf16>, vector<36x8xbf16>, vector<64x8xf32> -> vector<64x8xf32>
    %cst_9 = arith.constant dense<0.000000e+00> : vector<8xf32>
    %28 = vector.multi_reduction <add>, %27, %cst_9 [0] : vector<64x8xf32> to vector<8xf32>
    %29 = vector.shape_cast %28 : vector<8xf32> to vector<1x8xf32>
    %cst_10 = arith.constant 6.400000e+01 : f32
    %30 = vector.broadcast %cst_10 : f32 to vector<1x8xf32>
    %31 = arith.divf %29, %30 : vector<1x8xf32>
    %32 = vector.broadcast %31 : vector<1x8xf32> to vector<64x8xf32>
    %33 = arith.subf %27, %32 : vector<64x8xf32>
    %34 = arith.mulf %33, %33 : vector<64x8xf32>
    %cst_11 = arith.constant dense<0.000000e+00> : vector<8xf32>
    %35 = vector.multi_reduction <add>, %34, %cst_11 [0] : vector<64x8xf32> to vector<8xf32>
    %36 = vector.shape_cast %35 : vector<8xf32> to vector<1x8xf32>
    %cst_12 = arith.constant 6.400000e+01 : f32
    %37 = vector.broadcast %cst_12 : f32 to vector<1x8xf32>
    %38 = arith.divf %36, %37 : vector<1x8xf32>
    %cst_13 = arith.constant 9.99999974E-6 : f32
    %39 = vector.broadcast %cst_13 : f32 to vector<1x8xf32>
    %40 = arith.addf %38, %39 : vector<1x8xf32>
    %41 = math.rsqrt %40 : vector<1x8xf32>
    %42 = vector.broadcast %41 : vector<1x8xf32> to vector<64x8xf32>
    %43 = arith.mulf %33, %42 : vector<64x8xf32>
    %cst_14 = arith.constant 0.000000e+00 : f32
    %44 = vector.broadcast %cst_14 : f32 to vector<64x8xf32>
    %45 = arith.cmpf ogt, %43, %44 : vector<64x8xf32>
    %cst_15 = arith.constant 0.00999999977 : f32
    %46 = vector.broadcast %cst_15 : f32 to vector<64x8xf32>
    %47 = arith.mulf %46, %43 : vector<64x8xf32>
    %48 = arith.select %45, %43, %47 : vector<64x8xi1>, vector<64x8xf32>
    %49 = vector.shape_cast %48 : vector<64x8xf32> to vector<8x8x8xf32>
    %50 = arith.truncf %49 : vector<8x8x8xf32> to vector<8x8x8xbf16>
    %cst_16 = arith.constant 0.000000e+00 : bf16
    %51 = vector.broadcast %cst_16 : bf16 to vector<1x8x8xbf16>
    %52 = tpu.concatenate %51, %50, %51 in 0 : vector<1x8x8xbf16>, vector<8x8x8xbf16>, vector<1x8x8xbf16> -> vector<10x8x8xbf16>
    %cst_17 = arith.constant 0.000000e+00 : bf16
    %53 = vector.broadcast %cst_17 : bf16 to vector<10x1x8xbf16>
    %54 = tpu.concatenate %53, %52, %53 in 1 : vector<10x1x8xbf16>, vector<10x8x8xbf16>, vector<10x1x8xbf16> -> vector<10x10x8xbf16>
    %c0_18 = arith.constant 0 : index
    %c0_19 = arith.constant 0 : index
    %c0_20 = arith.constant 0 : index
    %55 = vector.load %arg3[%c0_18, %c0_19, %c0_20] : memref<9x8x8xbf16, #tpu.memory_space<vmem>>, vector<9x8x8xbf16>
    %56 = vector.extract_strided_slice %54 {offsets = [0, 0, 0], sizes = [8, 8, 8], strides = [1, 1, 1]} : vector<10x10x8xbf16> to vector<8x8x8xbf16>
    %57 = vector.extract_strided_slice %54 {offsets = [0, 1, 0], sizes = [8, 8, 8], strides = [1, 1, 1]} : vector<10x10x8xbf16> to vector<8x8x8xbf16>
    %58 = vector.extract_strided_slice %54 {offsets = [0, 2, 0], sizes = [8, 8, 8], strides = [1, 1, 1]} : vector<10x10x8xbf16> to vector<8x8x8xbf16>
    %59 = vector.extract_strided_slice %54 {offsets = [1, 0, 0], sizes = [8, 8, 8], strides = [1, 1, 1]} : vector<10x10x8xbf16> to vector<8x8x8xbf16>
    %60 = vector.extract_strided_slice %54 {offsets = [1, 1, 0], sizes = [8, 8, 8], strides = [1, 1, 1]} : vector<10x10x8xbf16> to vector<8x8x8xbf16>
    %61 = vector.extract_strided_slice %54 {offsets = [1, 2, 0], sizes = [8, 8, 8], strides = [1, 1, 1]} : vector<10x10x8xbf16> to vector<8x8x8xbf16>
    %62 = vector.extract_strided_slice %54 {offsets = [2, 0, 0], sizes = [8, 8, 8], strides = [1, 1, 1]} : vector<10x10x8xbf16> to vector<8x8x8xbf16>
    %63 = vector.extract_strided_slice %54 {offsets = [2, 1, 0], sizes = [8, 8, 8], strides = [1, 1, 1]} : vector<10x10x8xbf16> to vector<8x8x8xbf16>
    %64 = vector.extract_strided_slice %54 {offsets = [2, 2, 0], sizes = [8, 8, 8], strides = [1, 1, 1]} : vector<10x10x8xbf16> to vector<8x8x8xbf16>
    %65 = tpu.concatenate %56, %57, %58, %59, %60, %61, %62, %63, %64 in 2 : vector<8x8x8xbf16>, vector<8x8x8xbf16>, vector<8x8x8xbf16>, vector<8x8x8xbf16>, vector<8x8x8xbf16>, vector<8x8x8xbf16>, vector<8x8x8xbf16>, vector<8x8x8xbf16>, vector<8x8x8xbf16> -> vector<8x8x72xbf16>
    %66 = vector.shape_cast %65 : vector<8x8x72xbf16> to vector<64x72xbf16>
    %67 = vector.shape_cast %55 : vector<9x8x8xbf16> to vector<72x8xbf16>
    %cst_21 = arith.constant dense<0.000000e+00> : vector<64x8xf32>
    %68 = tpu.matmul %66, %67, %cst_21 {dimension_numbers = #tpu.dot_dimension_numbers<[1], [0], [0], [1], [0, 0, 1, 1], [], []>} : vector<64x72xbf16>, vector<72x8xbf16>, vector<64x8xf32> -> vector<64x8xf32>
    %cst_22 = arith.constant dense<0.000000e+00> : vector<8xf32>
    %69 = vector.multi_reduction <add>, %68, %cst_22 [0] : vector<64x8xf32> to vector<8xf32>
    %70 = vector.shape_cast %69 : vector<8xf32> to vector<1x8xf32>
    %cst_23 = arith.constant 6.400000e+01 : f32
    %71 = vector.broadcast %cst_23 : f32 to vector<1x8xf32>
    %72 = arith.divf %70, %71 : vector<1x8xf32>
    %73 = vector.broadcast %72 : vector<1x8xf32> to vector<64x8xf32>
    %74 = arith.subf %68, %73 : vector<64x8xf32>
    %75 = arith.mulf %74, %74 : vector<64x8xf32>
    %cst_24 = arith.constant dense<0.000000e+00> : vector<8xf32>
    %76 = vector.multi_reduction <add>, %75, %cst_24 [0] : vector<64x8xf32> to vector<8xf32>
    %77 = vector.shape_cast %76 : vector<8xf32> to vector<1x8xf32>
    %cst_25 = arith.constant 6.400000e+01 : f32
    %78 = vector.broadcast %cst_25 : f32 to vector<1x8xf32>
    %79 = arith.divf %77, %78 : vector<1x8xf32>
    %cst_26 = arith.constant 9.99999974E-6 : f32
    %80 = vector.broadcast %cst_26 : f32 to vector<1x8xf32>
    %81 = arith.addf %79, %80 : vector<1x8xf32>
    %82 = math.rsqrt %81 : vector<1x8xf32>
    %83 = vector.broadcast %82 : vector<1x8xf32> to vector<64x8xf32>
    %84 = arith.mulf %74, %83 : vector<64x8xf32>
    %cst_27 = arith.constant 0.000000e+00 : f32
    %85 = vector.broadcast %cst_27 : f32 to vector<64x8xf32>
    %86 = arith.cmpf ogt, %84, %85 : vector<64x8xf32>
    %cst_28 = arith.constant 0.00999999977 : f32
    %87 = vector.broadcast %cst_28 : f32 to vector<64x8xf32>
    %88 = arith.mulf %87, %84 : vector<64x8xf32>
    %89 = arith.select %86, %84, %88 : vector<64x8xi1>, vector<64x8xf32>
    %90 = tpu.transpose %89, [1, 0] : vector<64x8xf32> -> vector<8x64xf32>
    %91 = arith.truncf %90 : vector<8x64xf32> to vector<8x64xbf16>
    %c0_29 = arith.constant 0 : index
    %c0_30 = arith.constant 0 : index
    %c0_31 = arith.constant 0 : index
    %92 = vector.load %arg4[%c0_29, %c0_30, %c0_31] : memref<1x8x64xbf16, #tpu.memory_space<vmem>>, vector<1x8x64xbf16>
    %93 = vector.shape_cast %92 : vector<1x8x64xbf16> to vector<8x64xbf16>
    %94 = vector.shape_cast %91 : vector<8x64xbf16> to vector<1x8x64xbf16>
    tpu.vector_store %arg4[%c0_29, %c0_30, %c0_31], %94 {strides = array<i32>} : memref<1x8x64xbf16, #tpu.memory_space<vmem>>, vector<1x8x64xbf16>,
    return
  }
  func.func @transform_0(%arg0: i32) -> (i32, i32, i32, i32, i32) {
    %c0_i32 = arith.constant 0 : i32
    %c0_i32_0 = arith.constant 0 : i32
    %c0_i32_1 = arith.constant 0 : i32
    %c0_i32_2 = arith.constant 0 : i32
    %c0_i32_3 = arith.constant 0 : i32
    return %arg0, %c0_i32, %c0_i32_0, %c0_i32_1, %c0_i32_2 : i32, i32, i32, i32, i32
  }
  func.func @transform_1(%arg0: i32) -> (i32, i32, i32) {
    %c0_i32 = arith.constant 0 : i32
    %c0_i32_0 = arith.constant 0 : i32
    %c0_i32_1 = arith.constant 0 : i32
    %c0_i32_2 = arith.constant 0 : i32
    return %c0_i32, %c0_i32_0, %c0_i32_1 : i32, i32, i32
  }
  func.func @transform_2(%arg0: i32) -> (i32, i32, i32) {
    %c0_i32 = arith.constant 0 : i32
    %c0_i32_0 = arith.constant 0 : i32
    %c0_i32_1 = arith.constant 0 : i32
    %c0_i32_2 = arith.constant 0 : i32
    return %c0_i32, %c0_i32_0, %c0_i32_1 : i32, i32, i32
  }
  func.func @transform_3(%arg0: i32) -> (i32, i32, i32) {
    %c0_i32 = arith.constant 0 : i32
    %c0_i32_0 = arith.constant 0 : i32
    %c0_i32_1 = arith.constant 0 : i32
    return %arg0, %c0_i32, %c0_i32_0 : i32, i32, i32
  }
}

</mosaic_0001>

<bundles_post_ra>
// kernel: tpu_custom_call.1
= control target key start
LH: loop header
LB: loop body
LE: loop exit
PB: predicated region body
PF: predicated region fallthrough
CT: control target
= control target key end

     0   :  { %8 = vsyncpa [#allocation3], 0  ;;  %s2906_s0 = inlined_call_operand.hbm [shape: bf16[2,8,2,8,8], index: 0, kind: input, shape index: {}]   ;;  %s2907_s1 = inlined_call_operand.vmem [shape: bf16[9,4,8], index: 1, kind: input, shape index: {}]   ;;  %s2908_s2 = inlined_call_operand.vmem [shape: bf16[9,8,8], index: 2, kind: input, shape index: {}]   ;;  %s2909_s3 = inlined_call_operand.hbm [shape: bf16[2,8,64], index: 3, kind: output, shape index: {}]  }
   0x1   :  { %10 = vsyncpa [#allocation3 + $0x1], 0 }
   0x2   :  { %11 = vsyncpa [#allocation4], 0 }
   0x3   :  { %13 = vsyncpa [#allocation4 + $0x1], 0  ;;  %s2020_s12 = smov 0   ;;  %s2022_s13 = smov 0  }
   0x4   :  { %s2024_s14 = smov 0   ;;  %s2026_s15 = smov 0  }
   0x5 LB: > { %s2041_s16 = sadd.s32 4294967295, %s1979_s15   ;;  %s1724_s17 = sadd.s32 4294967294, %s1979_s15   ;;  %s1979_s15 = sphi %s2026_s15, %s2933_s15   ;;  %s1975_s14 = sphi %s2024_s14, %s2932_s14   ;;  %s1971_s13 = sphi %s2022_s13, %s2931_s13   ;;  %s1967_s12 = sphi %s2020_s12, %s2930_s12  }
   0x6   : > { %s2045_s18 = sadd.s32 1, %s1979_s15   ;;  %s26_s19 = sadd.s32 1, %s1975_s14 }
   0x7   : > { %s23_s20 = ssub.s32 %s1979_s15, %s2045_s18  ;;  %p33_p0 = scmp.ne.s32.totalorder %s1975_s14, %s1971_s13 }
   0x8   : > { %p24_p1 = scmp.eq.s32.totalorder %s23_s20, 0  ;;  %p34_p2 = scmp.eq.s32.totalorder %s1979_s15, 0 }
   0x9   : > { %p39_p3 = scmp.ne.s32.totalorder %s1971_s13, %s1967_s12  ;;  %p40_p4 = scmp.eq.s32.totalorder %s2041_s16, 0 }
   0xa   : > { %s2057_s21 = scalar_select %p24_p1, %s1975_s14, %s26_s19  }
   0xb   : > { %p2059_p5 = por %p34_p2, %p33_p0  ;;  %p2063_p6 = por %p40_p4, %p39_p3 }
   0xc   : > { %p105_p7 = scmp.eq.s32.totalorder %s2041_s16, 1  ;;  %p111_p8 = scmp.eq.s32.totalorder %s1724_s17, 1 }
   0xd   : > { %p1822_p10 = scmp.lt.s32.totalorder %s1979_s15, 2  ;;  %s137_s26 = sand.u32 1, %s1975_s14  }
   0xe   : > { %p2070_p11 = por %p105_p7, %p33_p0  ;;  %p2074_p12 = por %p111_p8, %p39_p3 }
   0xf   : > { %s1759_s27 = sshll.u32 %s1979_s15, 10  ;;  %s1727_s28 = sshll.u32 %s137_s26, 6 }
  0x10   : > { %s2916_s24 = scalar_select %p2070_p11, 1, 0 }
  0x11   : > { %s2917_s25 = scalar_select %p2074_p12, 1, 0 }
  0x12   : > { %s2083_s4 = scalar_lea.hbm %s2906_s0, %s1759_s27  ;;  %s141_s5 = scalar_lea.vmem [#allocation2], %s1727_s28 }
  0x13   : > { %s148_s6 = sshll.u32 %s141_s5, 4  ;;  %p2087_p13 = pnand %p1822_p10, %p2059_p5  ;;  %s2091_s6 = int_to_ptr.vmem [resolvable:$true] %s148_s6 }
  0x14   : > { %s2093_s8 = scalar_lea.sflag [#allocation3], %s137_s26  ;;  %s1883_s9 = scalar_lea.hbm %s2083_s4, 1024 }
  0x15   : > { %p1884_p0 = scmp.ne.s32.totalorder %s2083_s4, %s1883_s9  ;;  %p1885_p1 = pneg %p2087_p13 }
  0x16   : > { %s1888_s17 = scalar_lea.hbm %s2906_s0, 2048  ;;  %p1889_p4 = scmp.lt.u32.totalorder %s2083_s4, %s2906_s0 }
  0x17   : > { %p1886_p2 = pnand %p1885_p1, %p1884_p0  ;;  %p1890_p5 = scmp.lt.u32.totalorder %s1888_s17, %s1883_s9 }
  0x18   : > { %p1892_p8 = scmp.lt.u32.totalorder %s1883_s9, %s2083_s4 }
  0x19   : > { %p1887_p3 = pneg %p1886_p2  ;;  %p1891_p7 = por %p1890_p5, %p1889_p4 }
  0x1b   : > { %p1893_p10 = por %p1892_p8, %p1891_p7 }
  0x1d   : > { %p1894_p9 = pnand %p1893_p10, %p1887_p3 }
  0x1f   : > { %1897 = shalt.err (!%p1894_p9)
}
  0x20   : > { %s1898_s22 = scalar_lea.vmem %s2091_s6, 1024  ;;  %s1981_s26 = smov [#allocation2]  }
  0x21   : > { %p1899_p0 = scmp.ne.s32.totalorder %s2091_s6, %s1898_s22  ;;  %s1903_s27 = sshll.u32 %s1981_s26, 4  ;;  %s1904_s27 = int_to_ptr.vmem [resolvable:$false] %s1903_s27 }
  0x22   : > { %s1905_s28 = scalar_lea.vmem %s1904_s27, 2048  ;;  %p1906_p11 = scmp.lt.s32.totalorder %s2091_s6, %s1904_s27 }
  0x23   : > { %p1901_p2 = pnand %p1899_p0, %p1885_p1  ;;  %p1907_p4 = scmp.lt.s32.totalorder %s1905_s28, %s1898_s22 }
  0x25   : > { %p1902_p12 = pneg %p1901_p2  ;;  %p1908_p5 = por %p1907_p4, %p1906_p11 }
  0x27   : > { %p1909_p7 = pnand %p1908_p5, %p1902_p12 }
  0x29   : > { %1912 = shalt.err (!%p1909_p7)
}
  0x2a   : > { %s1982_s29 = smov 64   ;;  %s1983_s30 = smov 4  }
  0x2b   : > { %1817 = dma.hbm_to_vmem [thread:$0]  (!%p2087_p13), %s2083_s4, 1024, %s2091_s6, %s2093_s8, %s1982_s29, %s1982_s29, %s1983_s30  }
  0x2c   : > { %p1730_p9 = scmp.ge.s32.totalorder %s1979_s15, 1  ;;  %p156_p1 = scmp.lt.s32.totalorder %s1979_s15, 3 }
  0x2e   : > { %p157_p3 = pnand %p1730_p9, %p156_p1 }
  0x30   : > { %160 = sbr.rel (%p157_p3) target bundleno = 1392 (0x570), region = 32 }
  0x37   : > { %s2124_s5 = sand.u32 1, %s1971_s13  }
  0x38   : > { %s1731_s9 = sshll.u32 %s2124_s5, 6  ;;  %s163_s10 = scalar_lea.sflag [#allocation3], %s2124_s5 }
  0x39   : > { %s2128_s11 = scalar_lea.vmem [#allocation2], %s1731_s9 }
  0x3a   : > { %1958 = dma.done.wait (%p2063_p6), %s163_s10, 1024  }
  0x3b   : > { %1960 = vsyncadd (%p2063_p6), %s163_s10, 4294966272  ;;  %vm326_vm0 = vcmask 1040384   ;;  %vm327_vm1 = vsmask.f32 256  ;;  %v1984_v0 = vmov 0   ;;  %vm338_vm3 = vcmask 1044480  }
  0x3c   : > { %v257_v1 = vrot.slane %v1984_v0, 7  ;;  %vm2134_vm2 = vmand %vm326_vm0, %vm327_vm1  ;;  %vm339_vm4 = vsmask.f32 4352  ;;  %v2921_v4 = vmov 0  ;;  %v194_v5 = vld [vmem:[%s2128_s11 + $0x10] sm:$0xf] }
  0x3d   : > { %vm2140_vm5 = vmand %vm338_vm3, %vm339_vm4  ;;  %v195_v6 = vld [vmem:[%s2128_s11 + $0x14] sm:$0xf]  ;;  %v190_v7 = vld [vmem:[%s2128_s11] sm:$0xf]  ;;  %s1985_s23 = smov 124   ;;  %s1986_s4 = smov 24  }
  0x3e   : > { %v329_v3 = vsel %vm2134_vm2, 0, %v257_v1  ;;  %v2922_v4 = vsel %vm2140_vm5, 4294967295, %v2921_v4  ;;  %v208_v8 = vmax.bf16 %v195_v6, %v194_v5  ;;  %v191_v9 = vld [vmem:[%s2128_s11 + $0x4] sm:$0xf]  ;;  %v196_v10 = vld [vmem:[%s2128_s11 + $0x18] sm:$0xf] }
  0x3f   : > { %2923 = vst [vmem:[#allocation8_spill] sm:$0xff] %v2922_v4  ;;  %v197_v11 = vld [vmem:[%s2128_s11 + $0x1c] sm:$0xf]  ;;  %v206_v12 = vmax.bf16 %v191_v9, %v190_v7  ;;  %v192_v13 = vld [vmem:[%s2128_s11 + $0x8] sm:$0xf]  ;;  %v2154_v15 = vsel %vm2140_vm5, %v329_v3, 0 }
  0x40   : > { %v193_v14 = vld [vmem:[%s2128_s11 + $0xc] sm:$0xf]  ;;  %226 = vrot.lane.b32.xlu1 %v208_v8, %s1985_s23  ;;  %v209_v16 = vmax.bf16 %v197_v11, %v196_v10  ;;  %v200_v18 = vld [vmem:[%s2128_s11 + $0x28] sm:$0xf]  ;;  %v198_v20 = vld [vmem:[%s2128_s11 + $0x20] sm:$0xf] }
  0x41   : > { %222 = vrot.lane.b32.xlu0 %v206_v12, %s1985_s23  ;;  %v207_v17 = vmax.bf16 %v193_v14, %v192_v13  ;;  %v201_v19 = vld [vmem:[%s2128_s11 + $0x2c] sm:$0xf]  ;;  %v199_v21 = vld [vmem:[%s2128_s11 + $0x24] sm:$0xf]  ;;  %v362_v22 = vshll.u32 %v2154_v15, 16  ;;  %v360_v31 = vshrl.u32 %v2154_v15, 16 }
  0x42   : > { %v204_v23 = vld [vmem:[%s2128_s11 + $0x38] sm:$0xf]  ;;  %v205_v24 = vld [vmem:[%s2128_s11 + $0x3c] sm:$0xf]  ;;  %v211_v25 = vmax.bf16 %v201_v19, %v200_v18  ;;  %v210_v26 = vmax.bf16 %v199_v21, %v198_v20  ;;  %v202_v27 = vld [vmem:[%s2128_s11 + $0x30] sm:$0xf] }
  0x43   : > { %v203_v28 = vld [vmem:[%s2128_s11 + $0x34] sm:$0xf]  ;;  %v2165_v29 = vmax.bf16 %v205_v24, %v204_v23  ;;  %v364_v32 = vrot.slane %v362_v22, 1  ;;  %s1987_s6 = smov 4   ;;  %v2176_v34 = vrot.slane %v2154_v15, 1  ;;  %s1988_s7 = smov 28  }
  0x44   : > { %228 = vrot.lane.b32.xlu1 %v209_v16, %s1985_s23  ;;  %v212_v30 = vmax.bf16 %v203_v28, %v202_v27  ;;  %s1989_s8 = smov 8   ;;  %s1990_s17 = smov 12   ;;  %vm789_vm6 = vcmask 1041408   ;;  %vm568_vm7 = vcmask 31744   ;;  %vm585_vm8 = vcmask 64512  }
  0x45   : > { %224 = vrot.lane.b32.xlu0 %v207_v17, %s1985_s23  ;;  %v2169_v33 = vor.u32 %v364_v32, %v360_v31  ;;  %2924 = vst [vmem:[#allocation9_spill] sm:$0xff] %v2176_v34  ;;  %s1991_s19 = smov 20   ;;  %s1992_s20 = smov 32   ;;  %vm602_vm9 = vcmask 97280   ;;  %vm619_vm10 = vcmask 130048   ;;  %vm636_vm11 = vcmask 162816  }
  0x46   : > { %s1994_s22 = smov 16   ;;  %vm653_vm12 = vcmask 195584   ;;  %vm670_vm13 = vcmask 228352   ;;  %vm687_vm14 = vcmask 261120   ;;  %vm776_vm15 = vcmask 293888   ;;  %s1998_s11 = smov 64  }
  0x47   : > { %p2927_p11 = scmp.ne.s32.totalorder %s2916_s24, 0 }
  0x48   : > { %232 = vrot.lane.b32.xlu1 %v211_v25, %s1985_s23 }
  0x49   : > { %230 = vrot.lane.b32.xlu0 %v210_v26, %s1985_s23 }
  0x4c   : > { %236 = vrot.lane.b32.xlu1 %v2165_v29, %s1985_s23 }
  0x4d   : > { %234 = vrot.lane.b32.xlu0 %v212_v30, %s1985_s23  ;;  %s1641_s23 = scalar_lea.sflag [#allocation4], %s2124_s5 }
  0x50   : > { %534 = vrot.lane.b32.xlu1 %v2154_v15, %s1986_s4 }
  0x51   : > { %415 = vrot.lane.b32.xlu0 %v2169_v33, %s1987_s6 }
  0x54   : > { %550 = vrot.lane.b32.xlu1 %v2169_v33, %s1988_s7 }
  0x55   : > { %447 = vrot.lane.b32.xlu0 %v2176_v34, %s1989_s8 }
  0xb2   : > { %v227_v35 = vpop.permute.xlu1 %226 }
  0xb3   : > { %v248_v36 = vmax.bf16 %v227_v35, %v208_v8  ;;  %v223_v37 = vpop.permute.xlu0 %222 }
  0xb4   : > { %v246_v38 = vmax.bf16 %v223_v37, %v206_v12 }
  0xb5   : > { %v276_v39 = vshrl.u32 %v248_v36, 16  ;;  %v279_v40 = vshll.u32 %v248_v36, 16 }
  0xb6   : > { %v262_v41 = vshrl.u32 %v246_v38, 16  ;;  %v229_v42 = vpop.permute.xlu1 %228  ;;  %v265_v47 = vshll.u32 %v246_v38, 16 }
  0xb7   : > { %v278_v43 = vrot.slane %v276_v39, 7  ;;  %v249_v44 = vmax.bf16 %v229_v42, %v209_v16  ;;  %v225_v45 = vpop.permute.xlu0 %224 }
  0xb8   : > { %v264_v46 = vrot.slane %v262_v41, 7  ;;  %v247_v48 = vmax.bf16 %v225_v45, %v207_v17 }
  0xb9   : > { %v283_v49 = vshrl.u32 %v249_v44, 16  ;;  %v281_v50 = vor.u32 %v279_v40, %v278_v43  ;;  %v286_v52 = vshll.u32 %v249_v44, 16 }
  0xba   : > { %v267_v51 = vor.u32 %v265_v47, %v264_v46  ;;  %v269_v53 = vshrl.u32 %v247_v48, 16  ;;  %v233_v54 = vpop.permute.xlu1 %232  ;;  %v272_v58 = vshll.u32 %v247_v48, 16 }
  0xbb   : > { %v285_v55 = vrot.slane %v283_v49, 7  ;;  %v231_v56 = vpop.permute.xlu0 %230  ;;  %v251_v62 = vmax.bf16 %v233_v54, %v211_v25  ;;  %v332_v63 = vsel %vm2134_vm2, 0, %v281_v50 }
  0xbc   : > { %v271_v57 = vrot.slane %v269_v53, 7  ;;  %v330_v59 = vsel %vm2134_vm2, 0, %v267_v51  ;;  %v250_v60 = vmax.bf16 %v231_v56, %v210_v26  ;;  %v2196_v10 = vsel %vm2140_vm5, %v332_v63, 0  ;;  %v350_v63 = vld [vmem:[%s2907_s1] sm:$0x3] }
  0xbd   : > { %v2186_v61 = vsel %vm2140_vm5, %v330_v59, 0  ;;  %v288_v0 = vor.u32 %v286_v52, %v285_v55  ;;  %v297_v12 = vshrl.u32 %v251_v62, 16  ;;  %v300_v23 = vshll.u32 %v251_v62, 16 }
  0xbe   : > { %v274_v1 = vor.u32 %v272_v58, %v271_v57  ;;  %464 = vrot.lane.b32.xlu0 %v2186_v61, %s1990_s17  ;;  %v290_v3 = vshrl.u32 %v250_v60, 16  ;;  %v237_v5 = vpop.permute.xlu1 %236  ;;  %v293_v9 = vshll.u32 %v250_v60, 16  ;;  %v440_v40 = vrot.slane %v2186_v61, 1 }
  0xbf   : > { %v235_v6 = vpop.permute.xlu0 %234  ;;  %v333_v13 = vsel %vm2134_vm2, 0, %v288_v0  ;;  %v253_v16 = vmax.bf16 %v237_v5, %v2165_v29  ;;  %v299_v22 = vrot.slane %v297_v12, 7  ;;  %v442_v42 = vrot.slane %v2196_v10, 1  ;;  %v351_v0 = vld [vmem:[%s2907_s1 + $0x2] sm:$0x3] }
  0xc0   : > { %v331_v7 = vsel %vm2134_vm2, 0, %v274_v1  ;;  %v252_v8 = vmax.bf16 %v235_v6, %v212_v30  ;;  %v292_v14 = vrot.slane %v290_v3, 7  ;;  %v2211_v20 = vsel %vm2140_vm5, %v333_v13, 0  ;;  %v352_v5 = vld [vmem:[%s2907_s1 + $0x4] sm:$0x3] }
  0xc1   : > { %v2200_v11 = vsel %vm2140_vm5, %v331_v7, 0  ;;  %v311_v24 = vshrl.u32 %v253_v16, 16  ;;  %v302_v27 = vor.u32 %v300_v23, %v299_v22  ;;  %v314_v29 = vshll.u32 %v253_v16, 16  ;;  %v353_v6 = vld [vmem:[%s2907_s1 + $0x6] sm:$0x3] }
  0xc2   : > { %468 = vrot.lane.b32.xlu0 %v2196_v10, %s1990_s17  ;;  %466 = vrot.lane.b32.xlu1 %v2200_v11, %s1990_s17  ;;  %v304_v17 = vshrl.u32 %v252_v8, 16  ;;  %v307_v19 = vshll.u32 %v252_v8, 16  ;;  %v295_v21 = vor.u32 %v293_v9, %v292_v14  ;;  %v441_v41 = vrot.slane %v2200_v11, 1 }
  0xc3   : > { %v313_v28 = vrot.slane %v311_v24, 7  ;;  %v335_v32 = vsel %vm2134_vm2, 0, %v302_v27  ;;  %v443_v43 = vrot.slane %v2211_v20, 1  ;;  %v376_v47 = vshll.u32 %v2200_v11, 16 }
  0xc4   : > { %v306_v18 = vrot.slane %v304_v17, 7  ;;  %v334_v26 = vsel %vm2134_vm2, 0, %v295_v21  ;;  %v2241_v37 = vsel %vm2140_vm5, %v335_v32, 0  ;;  %v369_v50 = vshll.u32 %v2186_v61, 16  ;;  %v354_v17 = vld [vmem:[%s2907_s1 + $0x8] sm:$0x3] }
  0xc5   : > { %v2227_v31 = vsel %vm2140_vm5, %v334_v26, 0  ;;  %v316_v35 = vor.u32 %v314_v29, %v313_v28  ;;  %v445_v45 = vrot.slane %v2241_v37, 1  ;;  %v378_v49 = vrot.slane %v376_v47, 1  ;;  %v357_v21 = vld [vmem:[%s2907_s1 + $0xe] sm:$0x3] }
  0xc6   : > { %520 = vrot.lane.b32.xlu0 %v2200_v11, %s1986_s4  ;;  %470 = vrot.lane.b32.xlu1 %v2211_v20, %s1990_s17  ;;  %v309_v25 = vor.u32 %v307_v19, %v306_v18  ;;  %v444_v44 = vrot.slane %v2227_v31, 1  ;;  %v374_v51 = vshrl.u32 %v2200_v11, 16  ;;  %v371_v53 = vrot.slane %v369_v50, 1  ;;  %v355_v18 = vld [vmem:[%s2907_s1 + $0xa] sm:$0x3] }
  0xc7   : > { %v337_v38 = vsel %vm2134_vm2, 0, %v316_v35  ;;  %v383_v54 = vshll.u32 %v2196_v10, 16  ;;  %v367_v55 = vshrl.u32 %v2186_v61, 16  ;;  %v381_v56 = vshrl.u32 %v2196_v10, 16  ;;  %v356_v19 = vld [vmem:[%s2907_s1 + $0xc] sm:$0x3] }
  0xc8   : > { %v336_v30 = vsel %vm2134_vm2, 0, %v309_v25  ;;  %v2251_v39 = vsel %vm2140_vm5, %v337_v38, 0  ;;  %v379_v52 = vor.u32 %v378_v49, %v374_v51  ;;  %v1993_v59 = vmov 1983009808  }
  0xc9   : > { %v2237_v36 = vsel %vm2140_vm5, %v336_v30, 0  ;;  %v503_v48 = vrot.slane %v2251_v39, 1  ;;  %v372_v57 = vor.u32 %v371_v53, %v367_v55  ;;  %v385_v58 = vrot.slane %v383_v54, 1  ;;  %v2343_v54 = vpop.permute.xlu1 %534 }
  0xca   : > { %524 = vrot.lane.b32.xlu0 %v2211_v20, %s1986_s4  ;;  %522 = vrot.lane.b32.xlu1 %v2196_v10, %s1986_s4  ;;  %v446_v46 = vrot.slane %v2237_v36, 1  ;;  %v736_v60 = vunpack.c.l.s4 %v1993_v59  ;;  %v738_v62 = vlaneseq  ;;  %v733_v7 = vcombine.low %v350_v63, %v351_v0  ;;  %v1737_v38 = vld.sshfl [vmem:[%s2907_s1 + $0x10] sm:$0x3 pattern:$0x76325410] }
  0xcb   : > { %v386_v8 = vor.u32 %v385_v58, %v381_v56  ;;  %v390_v9 = vshll.u32 %v2211_v20, 16  ;;  %v734_v12 = vcombine.low %v352_v5, %v353_v6  ;;  %v750_v22 = vcombine.low %v354_v17, %v355_v18 }
  0xcc   : > { %v737_v1 = vunpack.c.0.s8 %v736_v60  ;;  %v739_v3 = vshrl.u32 %v738_v62, 7  ;;  %v388_v23 = vshrl.u32 %v2211_v20, 16  ;;  %v751_v26 = vcombine.low %v356_v19, %v357_v21 }
  0xcd   : > { %v392_v24 = vrot.slane %v390_v9, 1  ;;  %v404_v30 = vshll.u32 %v2241_v37, 16  ;;  %v397_v32 = vshll.u32 %v2227_v31, 16  ;;  %v411_v47 = vshll.u32 %v2237_v36, 16  ;;  %v2350_v59 = vpop.permute.xlu1 %550 }
  0xce   : > { %472 = vrot.lane.b32.xlu0 %v2227_v31, %s1990_s17  ;;  %526 = vrot.lane.b32.xlu1 %v2227_v31, %s1986_s4  ;;  %v740_v13 = vsub.s32 %v737_v1, %v739_v3  ;;  %v409_v49 = vshrl.u32 %v2237_v36, 16  ;;  %v483_v53 = vshll.u32 %v2251_v39, 16  ;;  %v481_v55 = vshrl.u32 %v2251_v39, 16 }
  0xcf   : > { %v393_v29 = vor.u32 %v392_v24, %v388_v23  ;;  %v413_v50 = vrot.slane %v411_v47, 1 }
  0xd0   : > { %v741_v14 = vrot.slane %v733_v7, %v740_v13  ;;  %v748_v16 = vrot.slane %v734_v12, %v740_v13  ;;  %v758_v27 = vrot.slane %v750_v22, %v740_v13  ;;  %v765_v28 = vrot.slane %v751_v26, %v740_v13 }
  0xd1   : > { %v414_v51 = vor.u32 %v413_v50, %v409_v49  ;;  %v485_v56 = vrot.slane %v483_v53, 1 }
  0xd2   : > { %474 = vrot.lane.b32.xlu1 %v2241_v37, %s1990_s17  ;;  %476 = vrot.lane.b32.xlu0 %v2237_v36, %s1990_s17  ;;  %v749_v25 = vcombine.low %v741_v14, %v748_v16  ;;  %v766_v35 = vcombine.low %v758_v27, %v765_v28 }
  0xd3   : > { %v486_v58 = vor.u32 %v485_v56, %v481_v55 }
  0xd4   : > { %1776 = vmatprep.subr.bf16.mxu0 %v749_v25 }
  0xd5   : > { %1777 = vmatpush3.bf16.msra.mxu0 %v749_v25 }
  0xd6   : > { %478 = vrot.lane.b32.xlu1 %v2251_v39, %s1990_s17  ;;  %528 = vrot.lane.b32.xlu0 %v2241_v37, %s1986_s4 }
  0xd7   : > { %1778 = vmatprep.subr.bf16.mxu0 %v766_v35 }
  0xd9   : > { %1779 = vmatpush3.bf16.msra.mxu0 %v766_v35 }
  0xda   : > { %530 = vrot.lane.b32.xlu1 %v2237_v36, %s1986_s4  ;;  %532 = vrot.lane.b32.xlu0 %v2251_v39, %s1986_s4 }
  0xdb   : > { %1808 = vmatprep.subr.msk.bf16.mxu0 %vm789_vm6, %v1737_v38 }
  0xde   : > { %449 = vrot.lane.b32.xlu1 %v440_v40, %s1989_s8  ;;  %451 = vrot.lane.b32.xlu0 %v441_v41, %s1989_s8 }
  0xe2   : > { %453 = vrot.lane.b32.xlu1 %v442_v42, %s1989_s8  ;;  %504 = vrot.lane.b32.xlu0 %v440_v40, %s1991_s19  ;;  %v402_v40 = vshrl.u32 %v2241_v37, 16 }
  0xe6   : > { %506 = vrot.lane.b32.xlu1 %v441_v41, %s1991_s19  ;;  %508 = vrot.lane.b32.xlu0 %v442_v42, %s1991_s19 }
  0xea   : > { %510 = vrot.lane.b32.xlu1 %v443_v43, %s1991_s19  ;;  %552 = vrot.lane.b32.xlu0 %v441_v41, %s1992_s20  ;;  %v406_v41 = vrot.slane %v404_v30, 1 }
  0xee   : > { %554 = vrot.lane.b32.xlu1 %v442_v42, %s1992_s20  ;;  %556 = vrot.lane.b32.xlu0 %v443_v43, %s1992_s20  ;;  %v395_v42 = vshrl.u32 %v2227_v31, 16 }
  0xf2   : > { %558 = vrot.lane.b32.xlu1 %v444_v44, %s1992_s20  ;;  %455 = vrot.lane.b32.xlu0 %v443_v43, %s1989_s8  ;;  %v399_v43 = vrot.slane %v397_v32, 1 }
  0xf6   : > { %457 = vrot.lane.b32.xlu1 %v444_v44, %s1989_s8  ;;  %459 = vrot.lane.b32.xlu0 %v445_v45, %s1989_s8 }
  0xfa   : > { %512 = vrot.lane.b32.xlu0 %v444_v44, %s1991_s19  ;;  %461 = vrot.lane.b32.xlu1 %v446_v46, %s1989_s8  ;;  %v791_v44 = vsel %vm789_vm6, %v1737_v38, 0 }
  0xfb   : > { %1781 = vmatpush3.bf16.msra.mxu0 %v791_v44 }
  0xfe   : > { %516 = vrot.lane.b32.xlu0 %v446_v46, %s1991_s19  ;;  %514 = vrot.lane.b32.xlu1 %v445_v45, %s1991_s19 }
 0x102   : > { %560 = vrot.lane.b32.xlu0 %v445_v45, %s1992_s20  ;;  %518 = vrot.lane.b32.xlu1 %v503_v48, %s1991_s19  ;;  %v407_v45 = vor.u32 %v406_v41, %v402_v40 }
 0x106   : > { %419 = vrot.lane.b32.xlu0 %v379_v52, %s1987_s6  ;;  %562 = vrot.lane.b32.xlu1 %v446_v46, %s1992_s20  ;;  %v400_v46 = vor.u32 %v399_v43, %v395_v42 }
 0x10a   : > { %487 = vrot.lane.b32.xlu0 %v372_v57, %s1994_s22  ;;  %417 = vrot.lane.b32.xlu1 %v372_v57, %s1987_s6 }
 0x10e   : > { %491 = vrot.lane.b32.xlu0 %v386_v8, %s1994_s22  ;;  %421 = vrot.lane.b32.xlu1 %v386_v8, %s1987_s6 }
 0x112   : > { %536 = vrot.lane.b32.xlu0 %v379_v52, %s1988_s7  ;;  %489 = vrot.lane.b32.xlu1 %v379_v52, %s1994_s22  ;;  %v416_v52 = vpop.permute.xlu0 %415 }
 0x116   : > { %540 = vrot.lane.b32.xlu0 %v393_v29, %s1988_s7  ;;  %493 = vrot.lane.b32.xlu1 %v393_v29, %s1994_s22  ;;  %v448_v57 = vpop.permute.xlu0 %447 }
 0x11a   : > { %423 = vrot.lane.b32.xlu0 %v393_v29, %s1987_s6  ;;  %538 = vrot.lane.b32.xlu1 %v386_v8, %s1988_s7 }
 0x11e   : > { %427 = vrot.lane.b32.xlu0 %v407_v45, %s1987_s6  ;;  %542 = vrot.lane.b32.xlu1 %v400_v46, %s1988_s7 }
 0x122   : > { %495 = vrot.lane.b32.xlu0 %v400_v46, %s1994_s22  ;;  %425 = vrot.lane.b32.xlu1 %v400_v46, %s1987_s6  ;;  %v570_v46 = vsel %vm568_vm7, %v2154_v15, %v416_v52 }
 0x123   : > { %v587_v53 = vsel %vm585_vm8, %v570_v46, %v448_v57 }
 0x126   : > { %499 = vrot.lane.b32.xlu0 %v414_v51, %s1994_s22  ;;  %429 = vrot.lane.b32.xlu1 %v414_v51, %s1987_s6  ;;  %s1995_s6 = smov 48  }
 0x12a   : > { %544 = vrot.lane.b32.xlu0 %v407_v45, %s1988_s7  ;;  %497 = vrot.lane.b32.xlu1 %v407_v45, %s1994_s22 }
 0x12e   : > { %548 = vrot.lane.b32.xlu0 %v486_v58, %s1988_s7  ;;  %501 = vrot.lane.b32.xlu1 %v486_v58, %s1994_s22 }
 0x130   : > { %v465_v60 = vpop.permute.xlu0 %464 }
 0x131   : > { %v604_v56 = vsel %vm602_vm9, %v587_v53, %v465_v60 }
 0x132   : > { %564 = vrot.lane.b32.xlu0 %v503_v48, %s1992_s20  ;;  %546 = vrot.lane.b32.xlu1 %v414_v51, %s1988_s7  ;;  %s1996_s7 = smov 56  }
 0x134   : > { %v467_v62 = vpop.permute.xlu1 %466  ;;  %v2356_v63 = vpop.permute.xlu0 %468 }
 0x136   : > { %566 = vrot.lane.b32.xlu1 %v2176_v34, %s1992_s20  ;;  %1099 = vrot.lane.b32.xlu0 %v2169_v33, %s1989_s8 }
 0x138   : > { %v2362_v0 = vpop.permute.xlu1 %470  ;;  %v2364_v1 = vpop.permute.xlu0 %520 }
 0x13a   : > { %1129 = vrot.lane.b32.xlu0 %v2176_v34, %s1994_s22  ;;  %1216 = vrot.lane.b32.xlu1 %v2154_v15, %s1995_s6 }
 0x13c   : > { %v2368_v39 = vpop.permute.xlu1 %522  ;;  %v2370_v48 = vpop.permute.xlu0 %524 }
 0x13e   : > { %1232 = vrot.lane.b32.xlu1 %v2169_v33, %s1996_s7 }
 0x140   : > { %v2372_v3 = vpop.permute.xlu1 %526  ;;  %v2374_v5 = vpop.permute.xlu0 %472 }
 0x144   : > { %v2376_v6 = vpop.permute.xlu1 %474  ;;  %v2378_v7 = vpop.permute.xlu0 %476 }
 0x148   : > { %v2380_v8 = vpop.permute.xlu1 %478  ;;  %v2382_v9 = vpop.permute.xlu0 %528 }
 0x14c   : > { %v2384_v12 = vpop.permute.xlu1 %530  ;;  %v2386_v13 = vpop.permute.xlu0 %532 }
 0x150   : > { %v450_v14 = vpop.permute.xlu1 %449  ;;  %v452_v16 = vpop.permute.xlu0 %451 }
 0x154   : > { %v454_v17 = vpop.permute.xlu1 %453  ;;  %v505_v18 = vpop.permute.xlu0 %504 }
 0x158   : > { %v507_v19 = vpop.permute.xlu1 %506  ;;  %v509_v21 = vpop.permute.xlu0 %508 }
 0x15c   : > { %v511_v22 = vpop.permute.xlu1 %510  ;;  %v553_v23 = vpop.permute.xlu0 %552 }
 0x160   : > { %v555_v24 = vpop.permute.xlu1 %554  ;;  %v2388_v25 = vpop.permute.xlu0 %556 }
 0x164   : > { %v2390_v26 = vpop.permute.xlu1 %558  ;;  %v2392_v27 = vpop.permute.xlu0 %455 }
 0x168   : > { %v2394_v28 = vpop.permute.xlu1 %457  ;;  %v2396_v29 = vpop.permute.xlu0 %459 }
 0x16c   : > { %v2398_v30 = vpop.permute.xlu1 %461  ;;  %v2400_v32 = vpop.permute.xlu0 %512 }
 0x170   : > { %v2402_v35 = vpop.permute.xlu1 %514  ;;  %v2404_v38 = vpop.permute.xlu0 %516 }
 0x174   : > { %v2406_v40 = vpop.permute.xlu1 %518  ;;  %v2408_v41 = vpop.permute.xlu0 %560 }
 0x178   : > { %v2410_v42 = vpop.permute.xlu1 %562  ;;  %v420_v43 = vpop.permute.xlu0 %419 }
 0x179   : > { %v574_v51 = vsel %vm568_vm7, %v2200_v11, %v420_v43 }
 0x17a   : > { %v591_v58 = vsel %vm585_vm8, %v574_v51, %v452_v16 }
 0x17b   : > { %v608_v60 = vsel %vm602_vm9, %v591_v58, %v2356_v63 }
 0x17c   : > { %v418_v44 = vpop.permute.xlu1 %417  ;;  %v488_v45 = vpop.permute.xlu0 %487 }
 0x17d   : > { %v572_v47 = vsel %vm568_vm7, %v2186_v61, %v418_v44  ;;  %v621_v61 = vsel %vm619_vm10, %v604_v56, %v488_v45 }
 0x17e   : > { %v589_v55 = vsel %vm585_vm8, %v572_v47, %v450_v14  ;;  %v638_v14 = vsel %vm636_vm11, %v621_v61, %v505_v18 }
 0x17f   : > { %v606_v4 = vsel %vm602_vm9, %v589_v55, %v467_v62 }
 0x180   : > { %v422_v49 = vpop.permute.xlu1 %421  ;;  %v492_v50 = vpop.permute.xlu0 %491 }
 0x181   : > { %v576_v52 = vsel %vm568_vm7, %v2196_v10, %v422_v49  ;;  %v625_v10 = vsel %vm619_vm10, %v608_v60, %v492_v50 }
 0x182   : > { %v593_v11 = vsel %vm585_vm8, %v576_v52, %v454_v17  ;;  %v655_v17 = vsel %vm653_vm12, %v638_v14, %v2364_v1  ;;  %v642_v18 = vsel %vm636_vm11, %v625_v10, %v509_v21 }
 0x183   : > { %v610_v62 = vsel %vm602_vm9, %v593_v11, %v2362_v0  ;;  %v659_v0 = vsel %vm653_vm12, %v642_v18, %v2370_v48 }
 0x184   : > { %v490_v44 = vpop.permute.xlu1 %489  ;;  %v537_v34 = vpop.permute.xlu0 %536 }
 0x185   : > { %v623_v57 = vsel %vm619_vm10, %v606_v4, %v490_v44  ;;  %v672_v63 = vsel %vm670_vm13, %v655_v17, %v537_v34 }
 0x186   : > { %v640_v45 = vsel %vm636_vm11, %v623_v57, %v507_v19  ;;  %v689_v1 = vsel %vm687_vm14, %v672_v63, %v553_v23 }
 0x187   : > { %v657_v46 = vsel %vm653_vm12, %v640_v45, %v2368_v39 }
 0x188   : > { %v494_v16 = vpop.permute.xlu1 %493  ;;  %v541_v43 = vpop.permute.xlu0 %540 }
 0x189   : > { %v627_v4 = vsel %vm619_vm10, %v610_v62, %v494_v16  ;;  %v676_v34 = vsel %vm670_vm13, %v659_v0, %v541_v43 }
 0x18a   : > { %v644_v19 = vsel %vm636_vm11, %v627_v4, %v511_v22  ;;  %v693_v48 = vsel %vm687_vm14, %v676_v34, %v2388_v25 }
 0x18b   : > { %v661_v39 = vsel %vm653_vm12, %v644_v19, %v2372_v3 }
 0x18c   : > { %v539_v47 = vpop.permute.xlu1 %538  ;;  %v424_v49 = vpop.permute.xlu0 %423 }
 0x18d   : > { %v674_v50 = vsel %vm670_vm13, %v657_v46, %v539_v47  ;;  %v578_v58 = vsel %vm568_vm7, %v2211_v20, %v424_v49 }
 0x18e   : > { %v691_v51 = vsel %vm687_vm14, %v674_v50, %v555_v24  ;;  %v595_v61 = vsel %vm585_vm8, %v578_v58, %v2392_v27 }
 0x18f   : > { %v1733_v21 = vcombine.low %v689_v1, %v691_v51  ;;  %v612_v20 = vsel %vm602_vm9, %v595_v61, %v2374_v5 }
 0x190   : > { %v543_v53 = vpop.permute.xlu1 %542  ;;  %v428_v55 = vpop.permute.xlu0 %427 }
 0x191   : > { %v678_v22 = vsel %vm670_vm13, %v661_v39, %v543_v53  ;;  %1782 = vmatprep.mubr.msk.bf16.mxu0 %vm776_vm15, %v1733_v21  ;;  %v582_v25 = vsel %vm568_vm7, %v2241_v37, %v428_v55 }
 0x192   : > { %v695_v23 = vsel %vm687_vm14, %v678_v22, %v2390_v26  ;;  %v599_v27 = vsel %vm585_vm8, %v582_v25, %v2396_v29 }
 0x193   : > { %v1734_v24 = vcombine.low %v693_v48, %v695_v23  ;;  %v616_v5 = vsel %vm602_vm9, %v599_v27, %v2378_v7 }
 0x194   : > { %v426_v56 = vpop.permute.xlu1 %425  ;;  %v496_v52 = vpop.permute.xlu0 %495 }
 0x195   : > { %1783 = vmatmul.mubr.msk.bf16.vlgmr.msra.gmra.mrb[0].mxu0 %vm776_vm15, %v1734_v24  ;;  %v580_v3 = vsel %vm568_vm7, %v2227_v31, %v426_v56  ;;  %v629_v14 = vsel %vm619_vm10, %v612_v20, %v496_v52 }
 0x196   : > { %v597_v26 = vsel %vm585_vm8, %v580_v3, %v2394_v28 }
 0x197   : > { %v614_v37 = vsel %vm602_vm9, %v597_v26, %v2376_v6 }
 0x198   : > { %v430_v44 = vpop.permute.xlu1 %429  ;;  %v500_v11 = vpop.permute.xlu0 %499 }
 0x199   : > { %v584_v57 = vsel %vm568_vm7, %v2237_v36, %v430_v44  ;;  %v646_v36 = vsel %vm636_vm11, %v629_v14, %v2400_v32  ;;  %v633_v29 = vsel %vm619_vm10, %v616_v5, %v500_v11 }
 0x19a   : > { %v601_v10 = vsel %vm585_vm8, %v584_v57, %v2398_v30  ;;  %v663_v62 = vsel %vm653_vm12, %v646_v36, %v2382_v9 }
 0x19b   : > { %v618_v16 = vsel %vm602_vm9, %v601_v10, %v2380_v8  ;;  %v650_v8 = vsel %vm636_vm11, %v633_v29, %v2404_v38 }
 0x19c   : > { %v498_v31 = vpop.permute.xlu1 %497  ;;  %v545_v60 = vpop.permute.xlu0 %544  ;;  %v667_v46 = vsel %vm653_vm12, %v650_v8, %v2386_v13 }
 0x19d   : > { %v631_v28 = vsel %vm619_vm10, %v614_v37, %v498_v31  ;;  %v680_v7 = vsel %vm670_vm13, %v663_v62, %v545_v60 }
 0x19e   : > { %v648_v30 = vsel %vm636_vm11, %v631_v28, %v2402_v35  ;;  %v697_v9 = vsel %vm687_vm14, %v680_v7, %v2408_v41 }
 0x19f   : > { %v665_v17 = vsel %vm653_vm12, %v648_v30, %v2384_v12 }
 0x1a0   : > { %v502_v43 = vpop.permute.xlu1 %501  ;;  %v549_v45 = vpop.permute.xlu0 %548 }
 0x1a1   : > { %v635_v6 = vsel %vm619_vm10, %v618_v16, %v502_v43  ;;  %v684_v47 = vsel %vm670_vm13, %v667_v46, %v549_v45 }
 0x1a2   : > { %v652_v32 = vsel %vm636_vm11, %v635_v6, %v2406_v40 }
 0x1a3   : > { %v669_v35 = vsel %vm653_vm12, %v652_v32, %v2343_v54 }
 0x1a4   : > { %v547_v4 = vpop.permute.xlu1 %546  ;;  %v565_v63 = vpop.permute.xlu0 %564  ;;  %v686_v12 = vsel %vm670_vm13, %v669_v35, %v2350_v59 }
 0x1a5   : > { %v682_v18 = vsel %vm670_vm13, %v665_v17, %v547_v4  ;;  %v701_v19 = vsel %vm687_vm14, %v684_v47, %v565_v63  ;;  %vm1331_vm13 = vcmask 392192  }
 0x1a6   : > { %v699_v40 = vsel %vm687_vm14, %v682_v18, %v2410_v42 }
 0x1a7   : > { %v1735_v38 = vcombine.low %v697_v9, %v699_v40 }
 0x1a8   : > { %v567_v49 = vpop.permute.xlu1 %566 }
 0x1a9   : > { %v703_v54 = vsel %vm687_vm14, %v686_v12, %v567_v49  ;;  %1786 = vmatprep.mubr.msk.bf16.mxu0 %vm776_vm15, %v1735_v38 }
 0x1aa   : > { %v1736_v41 = vcombine.low %v701_v19, %v703_v54 }
 0x1ac   : > { %1787 = vmatmul.mubr.msk.bf16.gmra.mrb[4].mxu0 %vm776_vm15, %v1736_v41  ;;  %vm1348_vm15 = vcmask 457728  }
 0x268   : > { %v1784_v13 = vpop.f32.mrb[0].mxu0 }
 0x269   : > { %v827_v59 = vpop.f32.mrb[1].mxu0  ;;  %v861_v34 = vsel %vm585_vm8, %v1784_v13, 0.0 }
 0x26a   : > { %v1785_v42 = vpop.f32.mrb[2].mxu0  ;;  %v858_v0 = vsel %vm585_vm8, %v827_v59, 0.0 }
 0x26b   : > { %v830_v50 = vpop.f32.mrb[3].mxu0  ;;  %v863_v39 = vsel %vm585_vm8, %v1785_v42, 0.0 }
 0x26c   : > { %v859_v1 = vsel %vm585_vm8, %v830_v50, 0.0 }
 0x26d   : > { %v860_v51 = vadd.f32 %v859_v1, %v858_v0 }
 0x26f   : > { %v862_v21 = vadd.f32 %v861_v34, %v860_v51 }
 0x271   : > { %v864_v53 = vadd.f32 %v863_v39, %v862_v21 }
 0x27f   : > { %v1788_v55 = vpop.f32.mrb[4].mxu0 }
 0x280   : > { %v843_v22 = vpop.f32.mrb[5].mxu0  ;;  %v869_v58 = vsel %vm585_vm8, %v1788_v55, 0.0 }
 0x281   : > { %v865_v48 = vsel %vm585_vm8, %v843_v22, 0.0  ;;  %v1789_v33 = vpop.f32.mrb[6].mxu0 }
 0x282   : > { %v866_v23 = vadd.f32 %v865_v48, %v864_v53  ;;  %v846_v24 = vpop.f32.mrb[7].mxu0  ;;  %v871_v61 = vsel %vm585_vm8, %v1789_v33, 0.0 }
 0x283   : > { %v867_v56 = vsel %vm585_vm8, %v846_v24, 0.0 }
 0x284   : > { %v868_v52 = vadd.f32 %v867_v56, %v866_v23 }
 0x286   : > { %v870_v3 = vadd.f32 %v869_v58, %v868_v52 }
 0x288   : > { %v872_v44 = vadd.f32 %v871_v61, %v870_v3 }
 0x28a   : > { %v873_v11 = vrot.slane %v872_v44, 4 }
 0x28c   : > { %v874_v25 = vadd.f32 %v873_v11, %v872_v44 }
 0x28e   : > { %v875_v26 = vrot.slane %v874_v25, 2 }
 0x290   : > { %v876_v57 = vadd.f32 %v875_v26, %v874_v25 }
 0x292   : > { %v877_v20 = vrot.slane %v876_v57, 1 }
 0x294   : > { %v878_v14 = vadd.f32 %v877_v20, %v876_v57 }
 0x296   : > { %v880_v31 = vmul.f32 0.015625, %v878_v14 }
 0x298   : > { %v881_v60 = vsub.f32 %v827_v59, %v880_v31  ;;  %v882_v27 = vsub.f32 %v830_v50, %v880_v31  ;;  %v883_v10 = vsub.f32 %v1784_v13, %v880_v31  ;;  %v884_v37 = vsub.f32 %v1785_v42, %v880_v31 }
 0x299   : > { %v885_v28 = vsub.f32 %v843_v22, %v880_v31  ;;  %v886_v36 = vsub.f32 %v846_v24, %v880_v31  ;;  %v887_v5 = vsub.f32 %v1788_v55, %v880_v31  ;;  %v888_v16 = vsub.f32 %v1789_v33, %v880_v31 }
 0x29a   : > { %v889_v43 = vmul.f32 %v881_v60, %v881_v60  ;;  %v890_v45 = vmul.f32 %v882_v27, %v882_v27  ;;  %v891_v29 = vmul.f32 %v883_v10, %v883_v10  ;;  %v892_v30 = vmul.f32 %v884_v37, %v884_v37 }
 0x29b   : > { %v893_v7 = vmul.f32 %v885_v28, %v885_v28  ;;  %v894_v4 = vmul.f32 %v886_v36, %v886_v36  ;;  %v895_v9 = vmul.f32 %v887_v5, %v887_v5  ;;  %v896_v46 = vmul.f32 %v888_v16, %v888_v16 }
 0x29c   : > { %v897_v6 = vsel %vm585_vm8, %v889_v43, 0.0  ;;  %v898_v62 = vsel %vm585_vm8, %v890_v45, 0.0  ;;  %v900_v8 = vsel %vm585_vm8, %v891_v29, 0.0  ;;  %v902_v18 = vsel %vm585_vm8, %v892_v30, 0.0 }
 0x29d   : > { %v899_v32 = vadd.f32 %v898_v62, %v897_v6  ;;  %v904_v40 = vsel %vm585_vm8, %v893_v7, 0.0  ;;  %v906_v38 = vsel %vm585_vm8, %v894_v4, 0.0  ;;  %v908_v12 = vsel %vm585_vm8, %v895_v9, 0.0 }
 0x29e   : > { %v910_v19 = vsel %vm585_vm8, %v896_v46, 0.0 }
 0x29f   : > { %v901_v17 = vadd.f32 %v900_v8, %v899_v32 }
 0x2a1   : > { %v903_v35 = vadd.f32 %v902_v18, %v901_v17 }
 0x2a3   : > { %v905_v63 = vadd.f32 %v904_v40, %v903_v35 }
 0x2a5   : > { %v907_v47 = vadd.f32 %v906_v38, %v905_v63  ;;  %v1878_v63 = vld [vmem:[%s2908_s2 + $0x20] ss:$0 sps:$4 sm:$0xff]  }
 0x2a7   : > { %v909_v49 = vadd.f32 %v908_v12, %v907_v47 }
 0x2a9   : > { %v911_v54 = vadd.f32 %v910_v19, %v909_v49 }
 0x2ab   : > { %v912_v41 = vrot.slane %v911_v54, 4 }
 0x2ad   : > { %v913_v13 = vadd.f32 %v912_v41, %v911_v54 }
 0x2af   : > { %v914_v59 = vrot.slane %v913_v13, 2 }
 0x2b1   : > { %v915_v42 = vadd.f32 %v914_v59, %v913_v13 }
 0x2b3   : > { %v916_v50 = vrot.slane %v915_v42, 1 }
 0x2b5   : > { %v917_v0 = vadd.f32 %v916_v50, %v915_v42 }
 0x2b7   : > { %v918_v1 = vmul.f32 0.015625, %v917_v0 }
 0x2b9   : > { %v919_v51 = vadd.f32 1e-05, %v918_v1 }
 0x2bb   : > { %1879 = vrsqrt.f32 %v919_v51 }
 0x2c5   : > { %v1880_v34 = vpop.eup %1879 }
 0x2c6   : > { %v923_v21 = vmul.f32 %v1880_v34, %v883_v10  ;;  %v924_v39 = vmul.f32 %v1880_v34, %v884_v37  ;;  %v925_v53 = vmul.f32 %v1880_v34, %v885_v28  ;;  %v926_v55 = vmul.f32 %v1880_v34, %v886_v36 }
 0x2c7   : > { %v2535_v22 = vmul.f32 %v1880_v34, %v887_v5  ;;  %v928_v48 = vmul.f32 %v1880_v34, %v888_v16  ;;  %v922_v33 = vmul.f32 %v1880_v34, %v882_v27  ;;  %v921_v23 = vmul.f32 %v1880_v34, %v881_v60 }
 0x2c8   : > { %v941_v24 = vmul.f32 0.01, %v925_v53  ;;  %v942_v56 = vmul.f32 0.01, %v926_v55  ;;  %vm932_vm3 = vcmp.gt.f32.partialorder %v924_v39, 0.0  ;;  %vm934_vm4 = vcmp.gt.f32.partialorder %v926_v55, 0.0 }
 0x2c9   : > { %vm930_vm0 = vcmp.gt.f32.partialorder %v922_v33, 0.0  ;;  %v938_v52 = vmul.f32 0.01, %v922_v33  ;;  %vm929_vm1 = vcmp.gt.f32.partialorder %v921_v23, 0.0  ;;  %v937_v58 = vmul.f32 0.01, %v921_v23 }
 0x2ca   : > { %v940_v3 = vmul.f32 0.01, %v924_v39  ;;  %vm931_vm6 = vcmp.gt.f32.partialorder %v923_v21, 0.0  ;;  %v939_v44 = vmul.f32 0.01, %v923_v21  ;;  %vm933_vm7 = vcmp.gt.f32.partialorder %v925_v53, 0.0 }
 0x2cb   : > { %v946_v61 = vsel %vm930_vm0, %v922_v33, %v938_v52  ;;  %v945_v25 = vsel %vm929_vm1, %v921_v23, %v937_v58  ;;  %v949_v57 = vsel %vm933_vm7, %v925_v53, %v941_v24  ;;  %v950_v20 = vsel %vm934_vm4, %v926_v55, %v942_v56 }
 0x2cc   : > { %v954_v11 = vpack.c.bf16 %v946_v61, %v946_v61  ;;  %v948_v26 = vsel %vm932_vm3, %v924_v39, %v940_v3  ;;  %v953_v14 = vpack.c.bf16 %v945_v25, %v945_v25  ;;  %v947_v27 = vsel %vm931_vm6, %v923_v21, %v939_v44 }
 0x2cd   : > { %v956_v31 = vpack.c.bf16 %v948_v26, %v948_v26  ;;  %v957_v10 = vpack.c.bf16 %v949_v57, %v949_v57  ;;  %v958_v36 = vpack.c.bf16 %v950_v20, %v950_v20  ;;  %v955_v43 = vpack.c.bf16 %v947_v27, %v947_v27 }
 0x2ce   : > { %v969_v60 = vshrl.u32 %v954_v11, 16  ;;  %v962_v37 = vshrl.u32 %v953_v14, 16  ;;  %v972_v16 = vshll.u32 %v954_v11, 16  ;;  %v965_v29 = vshll.u32 %v953_v14, 16 }
 0x2cf   : > { %v983_v28 = vshrl.u32 %v956_v31, 16  ;;  %v986_v6 = vshll.u32 %v956_v31, 16  ;;  %v976_v32 = vshrl.u32 %v955_v43, 16  ;;  %v990_v7 = vshrl.u32 %v957_v10, 16 }
 0x2d0   : > { %v971_v5 = vrot.slane %v969_v60, 7  ;;  %v964_v45 = vrot.slane %v962_v37, 7  ;;  %v943_v8 = vmul.f32 0.01, %v2535_v22  ;;  %v979_v9 = vshll.u32 %v955_v43, 16 }
 0x2d1   : > { %v985_v30 = vrot.slane %v983_v28, 7  ;;  %v978_v35 = vrot.slane %v976_v32, 7  ;;  %vm936_vm9 = vcmp.gt.f32.partialorder %v928_v48, 0.0  ;;  %v997_v40 = vshrl.u32 %v958_v36, 16 }
 0x2d2   : > { %v974_v62 = vor.u32 %v972_v16, %v971_v5  ;;  %v967_v17 = vor.u32 %v965_v29, %v964_v45  ;;  %v944_v47 = vmul.f32 0.01, %v928_v48  ;;  %v992_v54 = vrot.slane %v990_v7, 7  ;;  %v1874_v5 = vld [vmem:[%s2908_s2] sm:$0xff]  }
 0x2d3   : > { %v988_v4 = vor.u32 %v986_v6, %v985_v30  ;;  %v981_v19 = vor.u32 %v979_v9, %v978_v35  ;;  %vm935_vm11 = vcmp.gt.f32.partialorder %v2535_v22, 0.0  ;;  %v993_v59 = vshll.u32 %v957_v10, 16  ;;  %1790 = vmatprep.subr.bf16.mxu1 %v1874_v5  ;;  %v1875_v6 = vld [vmem:[%s2908_s2 + $0x8] sm:$0xff]   ;;  %v1877_v35 = vld [vmem:[%s2908_s2 + $0x18] sm:$0xff]  }
 0x2d4   : > { %v1026_v18 = vsel %vm2134_vm2, 0, %v974_v62  ;;  %v1025_v38 = vsel %vm2134_vm2, 0, %v967_v17  ;;  %v952_v41 = vsel %vm936_vm9, %v928_v48, %v944_v47  ;;  %v951_v50 = vsel %vm935_vm11, %v2535_v22, %v943_v8  ;;  %1791 = vmatpush3.bf16.msra.mxu1 %v1874_v5  ;;  %v1876_v17 = vld [vmem:[%s2908_s2 + $0x10] sm:$0xff]  }
 0x2d5   : > { %v2542_v46 = vsel %vm2140_vm5, %v1026_v18, 0  ;;  %v2550_v12 = vsel %vm2140_vm5, %v1025_v38, 0  ;;  %v1028_v49 = vsel %vm2134_vm2, 0, %v988_v4  ;;  %v1027_v13 = vsel %vm2134_vm2, 0, %v981_v19  ;;  %1792 = vmatprep.subr.bf16.mxu1 %v1875_v6 }
 0x2d6   : > { %1148 = vrot.lane.b32.xlu1 %v2542_v46, %s1986_s4  ;;  %1146 = vrot.lane.b32.xlu0 %v2550_v12, %s1986_s4  ;;  %v960_v42 = vpack.c.bf16 %v952_v41, %v952_v41  ;;  %v2562_v0 = vsel %vm2140_vm5, %v1028_v49, 0  ;;  %v959_v1 = vpack.c.bf16 %v951_v50, %v951_v50  ;;  %v999_v51 = vrot.slane %v997_v40, 7 }
 0x2d7   : > { %v2568_v34 = vsel %vm2140_vm5, %v1027_v13, 0  ;;  %v995_v21 = vor.u32 %v993_v59, %v992_v54  ;;  %v1000_v55 = vshll.u32 %v958_v36, 16  ;;  %v1122_v2 = vrot.slane %v2550_v12, 1 }
 0x2d8   : > { %v1011_v39 = vshrl.u32 %v960_v42, 16  ;;  %v1004_v53 = vshrl.u32 %v959_v1, 16  ;;  %v1014_v24 = vshll.u32 %v960_v42, 16  ;;  %v1007_v52 = vshll.u32 %v959_v1, 16  ;;  %1793 = vmatpush3.bf16.msra.mxu1 %v1875_v6 }
 0x2d9   : > { %v1002_v22 = vor.u32 %v1000_v55, %v999_v51  ;;  %v1029_v48 = vsel %vm2134_vm2, 0, %v995_v21  ;;  %v1124_v20 = vrot.slane %v2568_v34, 1  ;;  %v1123_v14 = vrot.slane %v2542_v46, 1  ;;  %1794 = vmatprep.subr.bf16.mxu1 %v1876_v17  ;;  %v2687_v55 = vpop.permute.xlu1 %1216 }
 0x2da   : > { %1152 = vrot.lane.b32.xlu1 %v2562_v0, %s1986_s4  ;;  %1150 = vrot.lane.b32.xlu0 %v2568_v34, %s1986_s4  ;;  %v1013_v33 = vrot.slane %v1011_v39, 7  ;;  %v1006_v23 = vrot.slane %v1004_v53, 7  ;;  %v2580_v56 = vsel %vm2140_vm5, %v1029_v48, 0  ;;  %v1125_v31 = vrot.slane %v2562_v0, 1 }
 0x2db   : > { %v1030_v58 = vsel %vm2134_vm2, 0, %v1002_v22  ;;  %v1126_v60 = vrot.slane %v2580_v56, 1  ;;  %v1053_v28 = vshll.u32 %v2550_v12, 16  ;;  %v1060_v36 = vshll.u32 %v2542_v46, 16 }
 0x2dc   : > { %v1016_v3 = vor.u32 %v1014_v24, %v1013_v33  ;;  %v1009_v61 = vor.u32 %v1007_v52, %v1006_v23  ;;  %v2590_v44 = vsel %vm2140_vm5, %v1030_v58, 0  ;;  %v1067_v43 = vshll.u32 %v2568_v34, 16  ;;  %1795 = vmatpush3.bf16.msra.mxu1 %v1876_v17  ;;  %v1100_v33 = vpop.permute.xlu0 %1099 }
 0x2dd   : > { %v1127_v10 = vrot.slane %v2590_v44, 1  ;;  %v1055_v16 = vrot.slane %v1053_v28, 1  ;;  %v1062_v45 = vrot.slane %v1060_v36, 1  ;;  %v1051_v29 = vshrl.u32 %v2550_v12, 16  ;;  %1796 = vmatprep.subr.bf16.mxu1 %v1877_v35  ;;  %v2693_v24 = vpop.permute.xlu1 %1232 }
 0x2de   : > { %1204 = vrot.lane.b32.xlu1 %v2568_v34, %s1995_s6  ;;  %1202 = vrot.lane.b32.xlu0 %v2542_v46, %s1995_s6  ;;  %v1032_v11 = vsel %vm2134_vm2, 0, %v1016_v3  ;;  %v1031_v25 = vsel %vm2134_vm2, 0, %v1009_v61  ;;  %v1058_v30 = vshrl.u32 %v2542_v46, 16  ;;  %v1069_v32 = vrot.slane %v1067_v43, 1 }
 0x2df   : > { %v2602_v26 = vsel %vm2140_vm5, %v1032_v11, 0  ;;  %v2608_v57 = vsel %vm2140_vm5, %v1031_v25, 0  ;;  %v1056_v62 = vor.u32 %v1055_v16, %v1051_v29  ;;  %v1065_v8 = vshrl.u32 %v2568_v34, 16 }
 0x2e0   : > { %v1128_v27 = vrot.slane %v2608_v57, 1  ;;  %v1185_v37 = vrot.slane %v2602_v26, 1  ;;  %v1063_v7 = vor.u32 %v1062_v45, %v1058_v30  ;;  %v1074_v18 = vshll.u32 %v2562_v0, 16  ;;  %1797 = vmatpush3.bf16.msra.mxu1 %v1877_v35  ;;  %v1130_v52 = vpop.permute.xlu0 %1129 }
 0x2e1   : > { %v1070_v4 = vor.u32 %v1069_v32, %v1065_v8  ;;  %v1072_v40 = vshrl.u32 %v2562_v0, 16  ;;  %vm1442_vm2 = vcmask 1043456   ;;  %v1081_v47 = vshll.u32 %v2580_v56, 16 }
 0x2e2   : > { %1208 = vrot.lane.b32.xlu1 %v2580_v56, %s1995_s6  ;;  %1206 = vrot.lane.b32.xlu0 %v2562_v0, %s1995_s6  ;;  %v1076_v9 = vrot.slane %v1074_v18, 1  ;;  %v1444_v49 = vsel %vm1442_vm2, %v1878_v63, 0  ;;  %v1088_v54 = vshll.u32 %v2590_v44, 16  ;;  %v1079_v41 = vshrl.u32 %v2580_v56, 16 }
 0x2e3   : > { %1809 = vmatprep.subr.msk.bf16.mxu1 %vm1442_vm2, %v1878_v63  ;;  %v1083_v19 = vrot.slane %v1081_v47, 1  ;;  %v1095_v59 = vshll.u32 %v2608_v57, 16  ;;  %v1086_v50 = vshrl.u32 %v2590_v44, 16  ;;  %v1093_v21 = vshrl.u32 %v2608_v57, 16 }
 0x2e4   : > { %v1077_v38 = vor.u32 %v1076_v9, %v1072_v40  ;;  %1799 = vmatpush3.bf16.msra.mxu1 %v1444_v49  ;;  %v1090_v42 = vrot.slane %v1088_v54, 1  ;;  %v1165_v53 = vshll.u32 %v2602_v26, 16  ;;  %v1163_v48 = vshrl.u32 %v2602_v26, 16 }
 0x2e5   : > { %v1084_v13 = vor.u32 %v1083_v19, %v1079_v41  ;;  %v1097_v1 = vrot.slane %v1095_v59, 1  ;;  %v1251_v58 = vsel %vm585_vm8, %v2154_v15, %v1100_v33  ;;  %vm1314_vm5 = vcmask 326656  }
 0x2e6   : > { %1156 = vrot.lane.b32.xlu1 %v2590_v44, %s1986_s4  ;;  %1154 = vrot.lane.b32.xlu0 %v2580_v56, %s1986_s4  ;;  %v1091_v51 = vor.u32 %v1090_v42, %v1086_v50  ;;  %v1167_v22 = vrot.slane %v1165_v53, 1  ;;  %v1267_v61 = vsel %vm619_vm10, %v1251_v58, %v1130_v52  ;;  %vm1365_vm0 = vcmask 523264  }
 0x2e7   : > { %v1098_v39 = vor.u32 %v1097_v1, %v1093_v21  ;;  %vm1429_vm1 = vcmask 588800   ;;  %vm1638_vm9 = vcmask 519168  }
 0x2e8   : > { %v1168_v23 = vor.u32 %v1167_v22, %v1163_v48 }
 0x2ea   : > { %1160 = vrot.lane.b32.xlu1 %v2602_v26, %s1986_s4  ;;  %1158 = vrot.lane.b32.xlu0 %v2608_v57, %s1986_s4  ;;  %s1997_s4 = smov 40  }
 0x2ee   : > { %1212 = vrot.lane.b32.xlu1 %v2608_v57, %s1995_s6  ;;  %1210 = vrot.lane.b32.xlu0 %v2590_v44, %s1995_s6 }
 0x2f2   : > { %1131 = vrot.lane.b32.xlu1 %v1122_v2, %s1994_s22  ;;  %1214 = vrot.lane.b32.xlu0 %v2602_v26, %s1995_s6 }
 0x2f6   : > { %1135 = vrot.lane.b32.xlu1 %v1124_v20, %s1994_s22  ;;  %1133 = vrot.lane.b32.xlu0 %v1123_v14, %s1994_s22 }
 0x2fa   : > { %1188 = vrot.lane.b32.xlu1 %v1123_v14, %s1997_s4  ;;  %1186 = vrot.lane.b32.xlu0 %v1122_v2, %s1997_s4  ;;  %v2926_v2 = vld [vmem:[#allocation9_spill] sm:$0xff] }
 0x2fe   : > { %1192 = vrot.lane.b32.xlu1 %v1125_v31, %s1997_s4  ;;  %1190 = vrot.lane.b32.xlu0 %v1124_v20, %s1997_s4 }
 0x302   : > { %1236 = vrot.lane.b32.xlu1 %v1124_v20, %s1998_s11  ;;  %1234 = vrot.lane.b32.xlu0 %v1123_v14, %s1998_s11 }
 0x306   : > { %1240 = vrot.lane.b32.xlu1 %v1126_v60, %s1998_s11  ;;  %1238 = vrot.lane.b32.xlu0 %v1125_v31, %s1998_s11 }
 0x30a   : > { %1139 = vrot.lane.b32.xlu1 %v1126_v60, %s1994_s22  ;;  %1137 = vrot.lane.b32.xlu0 %v1125_v31, %s1994_s22 }
 0x30e   : > { %1143 = vrot.lane.b32.xlu1 %v1128_v27, %s1994_s22  ;;  %1141 = vrot.lane.b32.xlu0 %v1127_v10, %s1994_s22 }
 0x312   : > { %1196 = vrot.lane.b32.xlu1 %v1127_v10, %s1997_s4  ;;  %1194 = vrot.lane.b32.xlu0 %v1126_v60, %s1997_s4 }
 0x316   : > { %1200 = vrot.lane.b32.xlu1 %v1185_v37, %s1997_s4  ;;  %1198 = vrot.lane.b32.xlu0 %v1128_v27, %s1997_s4 }
 0x31a   : > { %1244 = vrot.lane.b32.xlu1 %v1128_v27, %s1998_s11  ;;  %1242 = vrot.lane.b32.xlu0 %v1127_v10, %s1998_s11 }
 0x31e   : > { %1101 = vrot.lane.b32.xlu1 %v1056_v62, %s1989_s8  ;;  %1103 = vrot.lane.b32.xlu0 %v1063_v7, %s1989_s8 }
 0x322   : > { %1105 = vrot.lane.b32.xlu1 %v1070_v4, %s1989_s8  ;;  %1169 = vrot.lane.b32.xlu0 %v1056_v62, %s1992_s20 }
 0x326   : > { %1171 = vrot.lane.b32.xlu1 %v1063_v7, %s1992_s20  ;;  %1173 = vrot.lane.b32.xlu0 %v1070_v4, %s1992_s20 }
 0x32a   : > { %1175 = vrot.lane.b32.xlu1 %v1077_v38, %s1992_s20  ;;  %1218 = vrot.lane.b32.xlu0 %v1063_v7, %s1996_s7 }
 0x32e   : > { %1220 = vrot.lane.b32.xlu1 %v1070_v4, %s1996_s7  ;;  %1222 = vrot.lane.b32.xlu0 %v1077_v38, %s1996_s7 }
 0x332   : > { %1224 = vrot.lane.b32.xlu1 %v1084_v13, %s1996_s7  ;;  %1107 = vrot.lane.b32.xlu0 %v1077_v38, %s1989_s8 }
 0x336   : > { %1109 = vrot.lane.b32.xlu1 %v1084_v13, %s1989_s8  ;;  %1111 = vrot.lane.b32.xlu0 %v1091_v51, %s1989_s8 }
 0x33a   : > { %1113 = vrot.lane.b32.xlu1 %v1098_v39, %s1989_s8  ;;  %1177 = vrot.lane.b32.xlu0 %v1084_v13, %s1992_s20  ;;  %s1732_s8 = sshll.u32 %s2124_s5, 2 }
 0x33b   : > { %s188_s10 = scalar_lea.vmem [#allocation5], %s1732_s8 }
 0x33c   : > { %s1654_s6 = sshll.u32 %s188_s10, 4  ;;  %s2864_s6 = int_to_ptr.vmem [resolvable:$true] %s1654_s6 }
 0x33d   : > { %s1913_s17 = scalar_lea.vmem %s2864_s6, 64 }
 0x33e   : > { %1179 = vrot.lane.b32.xlu1 %v1091_v51, %s1992_s20  ;;  %1181 = vrot.lane.b32.xlu0 %v1098_v39, %s1992_s20  ;;  %p1914_p6 = scmp.ne.s32.totalorder %s2864_s6, %s1913_s17 }
 0x340   : > { %p1915_p12 = pnand %p1914_p6, %p2927_p11 }
 0x342   : > { %1183 = vrot.lane.b32.xlu1 %v1168_v23, %s1992_s20  ;;  %1226 = vrot.lane.b32.xlu0 %v1091_v51, %s1996_s7  ;;  %s1756_s20 = sshll.u32 %s2041_s16, 6  ;;  %p1916_p13 = pneg %p1915_p12 }
 0x343   : > { %s1999_s16 = smov [#allocation5]  }
 0x344   : > { %s1917_s22 = sshll.u32 %s1999_s16, 4  ;;  %s1918_s22 = int_to_ptr.vmem [resolvable:$false] %s1917_s22 }
 0x345   : > { %s1919_s19 = scalar_lea.vmem %s1918_s22, 128  ;;  %p1920_p8 = scmp.lt.s32.totalorder %s2864_s6, %s1918_s22 }
 0x346   : > { %1228 = vrot.lane.b32.xlu1 %v1098_v39, %s1996_s7  ;;  %1230 = vrot.lane.b32.xlu0 %v1168_v23, %s1996_s7  ;;  %p1921_p10 = scmp.lt.s32.totalorder %s1919_s19, %s1913_s17 }
 0x348   : > { %v1149_v3 = vpop.permute.xlu1 %1148  ;;  %v1147_v11 = vpop.permute.xlu0 %1146  ;;  %p1922_p0 = por %p1921_p10, %p1920_p8 }
 0x349   : > { %v1283_v25 = vsel %vm653_vm12, %v1267_v61, %v1147_v11 }
 0x34a   : > { %1248 = vrot.lane.b32.xlu1 %v2926_v2, %s1998_s11  ;;  %1246 = vrot.lane.b32.xlu0 %v1185_v37, %s1998_s11  ;;  %s2862_s11 = scalar_lea.hbm %s2909_s3, %s1756_s20  ;;  %p1923_p2 = pnand %p1922_p0, %p1916_p13 }
 0x34c   : > { %v1153_v20 = vpop.permute.xlu1 %1152  ;;  %v1151_v14 = vpop.permute.xlu0 %1150 }
 0x350   : > { %v2707_v15 = vpop.permute.xlu1 %1204  ;;  %v1203_v31 = vpop.permute.xlu0 %1202 }
 0x354   : > { %v2709_v60 = vpop.permute.xlu1 %1208  ;;  %v2711_v27 = vpop.permute.xlu0 %1206 }
 0x358   : > { %v2713_v10 = vpop.permute.xlu1 %1156  ;;  %v2715_v28 = vpop.permute.xlu0 %1154 }
 0x35c   : > { %v2717_v36 = vpop.permute.xlu1 %1160  ;;  %v2719_v5 = vpop.permute.xlu0 %1158 }
 0x360   : > { %v2721_v16 = vpop.permute.xlu1 %1212  ;;  %v2723_v26 = vpop.permute.xlu0 %1210 }
 0x364   : > { %v1132_v37 = vpop.permute.xlu1 %1131  ;;  %v2725_v43 = vpop.permute.xlu0 %1214 }
 0x368   : > { %v1136_v45 = vpop.permute.xlu1 %1135  ;;  %v1134_v29 = vpop.permute.xlu0 %1133 }
 0x36c   : > { %v1189_v30 = vpop.permute.xlu1 %1188  ;;  %v1187_v6 = vpop.permute.xlu0 %1186 }
 0x370   : > { %v1193_v62 = vpop.permute.xlu1 %1192  ;;  %v1191_v32 = vpop.permute.xlu0 %1190 }
 0x374   : > { %v1237_v7 = vpop.permute.xlu1 %1236  ;;  %v1235_v8 = vpop.permute.xlu0 %1234 }
 0x378   : > { %v1241_v17 = vpop.permute.xlu1 %1240  ;;  %v1239_v4 = vpop.permute.xlu0 %1238 }
 0x37c   : > { %v2727_v18 = vpop.permute.xlu1 %1139  ;;  %v2729_v35 = vpop.permute.xlu0 %1137 }
 0x380   : > { %v2731_v9 = vpop.permute.xlu1 %1143  ;;  %v2733_v40 = vpop.permute.xlu0 %1141 }
 0x384   : > { %v2735_v63 = vpop.permute.xlu1 %1196  ;;  %v2737_v38 = vpop.permute.xlu0 %1194 }
 0x388   : > { %v2739_v47 = vpop.permute.xlu1 %1200  ;;  %v2741_v49 = vpop.permute.xlu0 %1198 }
 0x38c   : > { %v2743_v19 = vpop.permute.xlu1 %1244  ;;  %v2745_v54 = vpop.permute.xlu0 %1242 }
 0x390   : > { %v1102_v41 = vpop.permute.xlu1 %1101  ;;  %v1104_v13 = vpop.permute.xlu0 %1103 }
 0x391   : > { %v1253_v59 = vsel %vm585_vm8, %v2550_v12, %v1102_v41  ;;  %v1255_v50 = vsel %vm585_vm8, %v2542_v46, %v1104_v13 }
 0x392   : > { %v1269_v51 = vsel %vm619_vm10, %v1253_v59, %v1132_v37  ;;  %v1271_v39 = vsel %vm619_vm10, %v1255_v50, %v1134_v29 }
 0x393   : > { %v1285_v48 = vsel %vm653_vm12, %v1269_v51, %v1149_v3  ;;  %v1287_v52 = vsel %vm653_vm12, %v1271_v39, %v1151_v14 }
 0x394   : > { %v1106_v42 = vpop.permute.xlu1 %1105  ;;  %v1170_v1 = vpop.permute.xlu0 %1169 }
 0x395   : > { %v1257_v21 = vsel %vm585_vm8, %v2568_v34, %v1106_v42  ;;  %v1299_v53 = vsel %vm687_vm14, %v1283_v25, %v1170_v1 }
 0x396   : > { %v1273_v12 = vsel %vm619_vm10, %v1257_v21, %v1136_v45  ;;  %v1316_v46 = vsel %vm1314_vm5, %v1299_v53, %v1187_v6 }
 0x397   : > { %v1289_v11 = vsel %vm653_vm12, %v1273_v12, %v1153_v20  ;;  %v1333_v2 = vsel %vm1331_vm13, %v1316_v46, %v1203_v31 }
 0x398   : > { %v1172_v22 = vpop.permute.xlu1 %1171  ;;  %v1174_v33 = vpop.permute.xlu0 %1173 }
 0x399   : > { %v1301_v23 = vsel %vm687_vm14, %v1285_v48, %v1172_v22  ;;  %v1303_v34 = vsel %vm687_vm14, %v1287_v52, %v1174_v33 }
 0x39a   : > { %v1318_v61 = vsel %vm1314_vm5, %v1301_v23, %v1189_v30  ;;  %v1320_v37 = vsel %vm1314_vm5, %v1303_v34, %v1191_v32 }
 0x39b   : > { %v1335_v14 = vsel %vm1331_vm13, %v1318_v61, %v2707_v15  ;;  %v1337_v20 = vsel %vm1331_vm13, %v1320_v37, %v2711_v27 }
 0x39c   : > { %v1176_v58 = vpop.permute.xlu1 %1175  ;;  %v1219_v25 = vpop.permute.xlu0 %1218 }
 0x39d   : > { %v1305_v3 = vsel %vm687_vm14, %v1289_v11, %v1176_v58  ;;  %v1350_v45 = vsel %vm1348_vm15, %v1333_v2, %v1219_v25 }
 0x39e   : > { %v1322_v6 = vsel %vm1314_vm5, %v1305_v3, %v1193_v62  ;;  %v1367_v13 = vsel %vm1365_vm0, %v1350_v45, %v1235_v8 }
 0x39f   : > { %v1339_v15 = vsel %vm1331_vm13, %v1322_v6, %v2709_v60 }
 0x3a0   : > { %v1221_v29 = vpop.permute.xlu1 %1220  ;;  %v1223_v41 = vpop.permute.xlu0 %1222 }
 0x3a1   : > { %v1352_v30 = vsel %vm1348_vm15, %v1335_v14, %v1221_v29  ;;  %v1354_v32 = vsel %vm1348_vm15, %v1337_v20, %v1223_v41 }
 0x3a2   : > { %v1369_v31 = vsel %vm1365_vm0, %v1352_v30, %v1237_v7  ;;  %v1371_v1 = vsel %vm1365_vm0, %v1354_v32, %v1239_v4 }
 0x3a3   : > { %v1742_v59 = vcombine.low %v1367_v13, %v1369_v31 }
 0x3a4   : > { %v1225_v42 = vpop.permute.xlu1 %1224  ;;  %v1108_v50 = vpop.permute.xlu0 %1107 }
 0x3a5   : > { %v1356_v62 = vsel %vm1348_vm15, %v1339_v15, %v1225_v42  ;;  %1800 = vmatprep.mubr.msk.bf16.mxu1 %vm1429_vm1, %v1742_v59  ;;  %v1259_v7 = vsel %vm585_vm8, %v2562_v0, %v1108_v50 }
 0x3a6   : > { %v1373_v27 = vsel %vm1365_vm0, %v1356_v62, %v1241_v17  ;;  %v1275_v39 = vsel %vm619_vm10, %v1259_v7, %v2729_v35 }
 0x3a7   : > { %v1743_v8 = vcombine.low %v1371_v1, %v1373_v27  ;;  %v1291_v48 = vsel %vm653_vm12, %v1275_v39, %v2715_v28 }
 0x3a8   : > { %v1110_v51 = vpop.permute.xlu1 %1109  ;;  %v1112_v21 = vpop.permute.xlu0 %1111 }
 0x3a9   : > { %1801 = vmatmul.mubr.msk.bf16.vlgmr.msra.gmra.mrb[0].mxu1 %vm1429_vm1, %v1743_v8  ;;  %v1261_v60 = vsel %vm585_vm8, %v2580_v56, %v1110_v51  ;;  %v1263_v0 = vsel %vm585_vm8, %v2590_v44, %v1112_v21 }
 0x3aa   : > { %v1277_v4 = vsel %vm619_vm10, %v1261_v60, %v2727_v18  ;;  %v1279_v18 = vsel %vm619_vm10, %v1263_v0, %v2733_v40 }
 0x3ab   : > { %v1293_v12 = vsel %vm653_vm12, %v1277_v4, %v2713_v10 }
 0x3ac   : > { %v1114_v53 = vpop.permute.xlu1 %1113  ;;  %v1178_v22 = vpop.permute.xlu0 %1177 }
 0x3ad   : > { %v1265_v17 = vsel %vm585_vm8, %v2608_v57, %v1114_v53  ;;  %v1307_v33 = vsel %vm687_vm14, %v1291_v48, %v1178_v22 }
 0x3ae   : > { %v1281_v35 = vsel %vm619_vm10, %v1265_v17, %v2731_v9  ;;  %v1324_v44 = vsel %vm1314_vm5, %v1307_v33, %v2737_v38  ;;  %v1295_v9 = vsel %vm653_vm12, %v1279_v18, %v2719_v5 }
 0x3af   : > { %v1297_v28 = vsel %vm653_vm12, %v1281_v35, %v2717_v36  ;;  %v1341_v38 = vsel %vm1331_vm13, %v1324_v44, %v2723_v26 }
 0x3b0   : > { %v1180_v56 = vpop.permute.xlu1 %1179  ;;  %v1182_v23 = vpop.permute.xlu0 %1181 }
 0x3b1   : > { %v1309_v57 = vsel %vm687_vm14, %v1293_v12, %v1180_v56  ;;  %v1311_v40 = vsel %vm687_vm14, %v1295_v9, %v1182_v23 }
 0x3b2   : > { %v1326_v52 = vsel %vm1314_vm5, %v1309_v57, %v2735_v63  ;;  %v1328_v5 = vsel %vm1314_vm5, %v1311_v40, %v2741_v49 }
 0x3b3   : > { %v1343_v61 = vsel %vm1331_vm13, %v1326_v52, %v2721_v16  ;;  %v1345_v16 = vsel %vm1331_vm13, %v1328_v5, %v2725_v43 }
 0x3b4   : > { %v1184_v46 = vpop.permute.xlu1 %1183  ;;  %v1227_v34 = vpop.permute.xlu0 %1226 }
 0x3b5   : > { %v1313_v10 = vsel %vm687_vm14, %v1297_v28, %v1184_v46  ;;  %v1358_v36 = vsel %vm1348_vm15, %v1341_v38, %v1227_v34 }
 0x3b6   : > { %v1330_v58 = vsel %vm1314_vm5, %v1313_v10, %v2739_v47  ;;  %v1375_v47 = vsel %vm1365_vm0, %v1358_v36, %v2745_v54 }
 0x3b7   : > { %v1347_v3 = vsel %vm1331_vm13, %v1330_v58, %v2687_v55 }
 0x3b8   : > { %v1229_v63 = vpop.permute.xlu1 %1228  ;;  %v1231_v25 = vpop.permute.xlu0 %1230  ;;  %v1364_v37 = vsel %vm1348_vm15, %v1347_v3, %v2693_v24 }
 0x3b9   : > { %v1360_v11 = vsel %vm1348_vm15, %v1343_v61, %v1229_v63  ;;  %v1362_v45 = vsel %vm1348_vm15, %v1345_v16, %v1231_v25 }
 0x3ba   : > { %v1377_v26 = vsel %vm1365_vm0, %v1360_v11, %v2743_v19 }
 0x3bb   : > { %v1744_v2 = vcombine.low %v1375_v47, %v1377_v26 }
 0x3bc   : > { %v1249_v49 = vpop.permute.xlu1 %1248  ;;  %v1247_v29 = vpop.permute.xlu0 %1246 }
 0x3bd   : > { %v1381_v14 = vsel %vm1365_vm0, %v1364_v37, %v1249_v49  ;;  %1804 = vmatprep.mubr.msk.bf16.mxu1 %vm1429_vm1, %v1744_v2  ;;  %v1379_v55 = vsel %vm1365_vm0, %v1362_v45, %v1247_v29 }
 0x3be   : > { %v1745_v54 = vcombine.low %v1379_v55, %v1381_v14 }
 0x3c0   : > { %1805 = vmatmul.mubr.msk.bf16.gmra.mrb[4].mxu1 %vm1429_vm1, %v1745_v54 }
 0x47c   : > { %v1802_v19 = vpop.f32.mrb[0].mxu1 }
 0x47d   : > { %v1480_v6 = vpop.f32.mrb[1].mxu1  ;;  %v1514_v13 = vsel %vm585_vm8, %v1802_v19, 0.0 }
 0x47e   : > { %v1803_v30 = vpop.f32.mrb[2].mxu1  ;;  %v1511_v41 = vsel %vm585_vm8, %v1480_v6, 0.0 }
 0x47f   : > { %v1483_v43 = vpop.f32.mrb[3].mxu1  ;;  %v1516_v32 = vsel %vm585_vm8, %v1803_v30, 0.0 }
 0x480   : > { %v1512_v24 = vsel %vm585_vm8, %v1483_v43, 0.0 }
 0x481   : > { %v1513_v20 = vadd.f32 %v1512_v24, %v1511_v41 }
 0x483   : > { %v1515_v31 = vadd.f32 %v1514_v13, %v1513_v20 }
 0x485   : > { %v1517_v59 = vadd.f32 %v1516_v32, %v1515_v31 }
 0x493   : > { %v1806_v15 = vpop.f32.mrb[4].mxu1 }
 0x494   : > { %v1496_v42 = vpop.f32.mrb[5].mxu1  ;;  %v1522_v7 = vsel %vm585_vm8, %v1806_v15, 0.0 }
 0x495   : > { %v1518_v62 = vsel %vm585_vm8, %v1496_v42, 0.0  ;;  %v1807_v50 = vpop.f32.mrb[6].mxu1 }
 0x496   : > { %v1519_v1 = vadd.f32 %v1518_v62, %v1517_v59  ;;  %v1499_v27 = vpop.f32.mrb[7].mxu1  ;;  %v1524_v60 = vsel %vm585_vm8, %v1807_v50, 0.0 }
 0x497   : > { %v1520_v8 = vsel %vm585_vm8, %v1499_v27, 0.0 }
 0x498   : > { %v1521_v51 = vadd.f32 %v1520_v8, %v1519_v1 }
 0x49a   : > { %v1523_v21 = vadd.f32 %v1522_v7, %v1521_v51 }
 0x49c   : > { %v1525_v39 = vadd.f32 %v1524_v60, %v1523_v21 }
 0x49e   : > { %v1526_v53 = vrot.slane %v1525_v39, 4 }
 0x4a0   : > { %v1527_v22 = vadd.f32 %v1526_v53, %v1525_v39 }
 0x4a2   : > { %v1528_v4 = vrot.slane %v1527_v22, 2 }
 0x4a4   : > { %v1529_v17 = vadd.f32 %v1528_v4, %v1527_v22 }
 0x4a6   : > { %v1530_v0 = vrot.slane %v1529_v17, 1 }
 0x4a8   : > { %v1531_v48 = vadd.f32 %v1530_v0, %v1529_v17 }
 0x4aa   : > { %v1532_v33 = vmul.f32 0.015625, %v1531_v48 }
 0x4ac   : > { %v1533_v56 = vsub.f32 %v1480_v6, %v1532_v33  ;;  %v1534_v35 = vsub.f32 %v1483_v43, %v1532_v33  ;;  %v1535_v12 = vsub.f32 %v1802_v19, %v1532_v33  ;;  %v1536_v23 = vsub.f32 %v1803_v30, %v1532_v33 }
 0x4ad   : > { %v1537_v18 = vsub.f32 %v1496_v42, %v1532_v33  ;;  %v1538_v57 = vsub.f32 %v1499_v27, %v1532_v33  ;;  %v1539_v44 = vsub.f32 %v1806_v15, %v1532_v33  ;;  %v1540_v28 = vsub.f32 %v1807_v50, %v1532_v33 }
 0x4ae   : > { %v1541_v46 = vmul.f32 %v1533_v56, %v1533_v56  ;;  %v1542_v52 = vmul.f32 %v1534_v35, %v1534_v35  ;;  %v1543_v9 = vmul.f32 %v1535_v12, %v1535_v12  ;;  %v1544_v10 = vmul.f32 %v1536_v23, %v1536_v23 }
 0x4af   : > { %v1545_v38 = vmul.f32 %v1537_v18, %v1537_v18  ;;  %v1546_v63 = vmul.f32 %v1538_v57, %v1538_v57  ;;  %v1547_v25 = vmul.f32 %v1539_v44, %v1539_v44  ;;  %v1548_v26 = vmul.f32 %v1540_v28, %v1540_v28 }
 0x4b0   : > { %v1549_v34 = vsel %vm585_vm8, %v1541_v46, 0.0  ;;  %v1550_v40 = vsel %vm585_vm8, %v1542_v52, 0.0  ;;  %v1552_v36 = vsel %vm585_vm8, %v1543_v9, 0.0  ;;  %v1554_v5 = vsel %vm585_vm8, %v1544_v10, 0.0 }
 0x4b1   : > { %v1551_v58 = vadd.f32 %v1550_v40, %v1549_v34  ;;  %v1556_v3 = vsel %vm585_vm8, %v1545_v38, 0.0  ;;  %v1558_v2 = vsel %vm585_vm8, %v1546_v63, 0.0  ;;  %v1560_v37 = vsel %vm585_vm8, %v1547_v25, 0.0 }
 0x4b2   : > { %v1562_v45 = vsel %vm585_vm8, %v1548_v26, 0.0 }
 0x4b3   : > { %v1553_v61 = vadd.f32 %v1552_v36, %v1551_v58 }
 0x4b5   : > { %v1555_v11 = vadd.f32 %v1554_v5, %v1553_v61 }
 0x4b7   : > { %v1557_v47 = vadd.f32 %v1556_v3, %v1555_v11 }
 0x4b9   : > { %v1559_v16 = vadd.f32 %v1558_v2, %v1557_v47 }
 0x4bb   : > { %v1561_v49 = vadd.f32 %v1560_v37, %v1559_v16 }
 0x4bd   : > { %v1563_v14 = vadd.f32 %v1562_v45, %v1561_v49 }
 0x4bf   : > { %v1564_v29 = vrot.slane %v1563_v14, 4 }
 0x4c1   : > { %v1565_v55 = vadd.f32 %v1564_v29, %v1563_v14 }
 0x4c3   : > { %v1566_v54 = vrot.slane %v1565_v55, 2 }
 0x4c5   : > { %v1567_v19 = vadd.f32 %v1566_v54, %v1565_v55 }
 0x4c7   : > { %v1568_v6 = vrot.slane %v1567_v19, 1 }
 0x4c9   : > { %v1569_v30 = vadd.f32 %v1568_v6, %v1567_v19 }
 0x4cb   : > { %v1570_v43 = vmul.f32 0.015625, %v1569_v30 }
 0x4cd   : > { %v1571_v41 = vadd.f32 1e-05, %v1570_v43 }
 0x4cf   : > { %1881 = vrsqrt.f32 %v1571_v41 }
 0x4d9   : > { %v1882_v24 = vpop.eup %1881 }
 0x4da   : > { %v1578_v20 = vmul.f32 %v1882_v24, %v1538_v57  ;;  %v1573_v13 = vmul.f32 %v1882_v24, %v1533_v56  ;;  %v1574_v31 = vmul.f32 %v1882_v24, %v1534_v35  ;;  %v1575_v32 = vmul.f32 %v1882_v24, %v1535_v12 }
 0x4db   : > { %v1576_v59 = vmul.f32 %v1882_v24, %v1536_v23  ;;  %v1577_v15 = vmul.f32 %v1882_v24, %v1537_v18  ;;  %v1579_v42 = vmul.f32 %v1882_v24, %v1539_v44  ;;  %v1580_v62 = vmul.f32 %v1882_v24, %v1540_v28 }
 0x4dc   : > { %vm1581_vm8 = vcmp.gt.f32.partialorder %v1573_v13, 0.0  ;;  %v1589_v50 = vmul.f32 0.01, %v1573_v13  ;;  %v1590_v27 = vmul.f32 0.01, %v1574_v31  ;;  %vm1582_vm10 = vcmp.gt.f32.partialorder %v1574_v31, 0.0 }
 0x4dd   : > { %v1591_v51 = vmul.f32 0.01, %v1575_v32  ;;  %vm1583_vm12 = vcmp.gt.f32.partialorder %v1575_v32, 0.0  ;;  %v1592_v21 = vmul.f32 0.01, %v1576_v59  ;;  %vm1584_vm14 = vcmp.gt.f32.partialorder %v1576_v59, 0.0 }
 0x4de   : > { %v1597_v1 = vsel %vm1581_vm8, %v1573_v13, %v1589_v50  ;;  %v1598_v8 = vsel %vm1582_vm10, %v1574_v31, %v1590_v27  ;;  %v1593_v39 = vmul.f32 0.01, %v1577_v15  ;;  %vm1585_vm3 = vcmp.gt.f32.partialorder %v1577_v15, 0.0 }
 0x4df   : > { %1605 = vxpose.xlu0.b32.start [1/8] (short) (narrow) %v1597_v1, 8  ;;  %v1599_v7 = vsel %vm1583_vm12, %v1575_v32, %v1591_v51  ;;  %v1600_v60 = vsel %vm1584_vm14, %v1576_v59, %v1592_v21  ;;  %v1594_v22 = vmul.f32 0.01, %v1578_v20  ;;  %vm1586_vm4 = vcmp.gt.f32.partialorder %v1578_v20, 0.0 }
 0x4e0   : > { %v1601_v53 = vsel %vm1585_vm3, %v1577_v15, %v1593_v39  ;;  %v1595_v17 = vmul.f32 0.01, %v1579_v42  ;;  %vm1587_vm6 = vcmp.gt.f32.partialorder %v1579_v42, 0.0  ;;  %v1596_v48 = vmul.f32 0.01, %v1580_v62 }
 0x4e1   : > { %v1602_v4 = vsel %vm1586_vm4, %v1578_v20, %v1594_v22  ;;  %vm1588_vm7 = vcmp.gt.f32.partialorder %v1580_v62, 0.0 }
 0x4e2   : > { %v1603_v0 = vsel %vm1587_vm6, %v1579_v42, %v1595_v17  ;;  %v1604_v33 = vsel %vm1588_vm7, %v1580_v62, %v1596_v48 }
 0x4e3   : > { %1606 = vxpose.xlu0.b32.cont [2/8] (short) (narrow) %v1598_v8, 8 }
 0x4e7   : > { %1607 = vxpose.xlu0.b32.cont [3/8] (short) (narrow) %v1599_v7, 8 }
 0x4eb   : > { %1608 = vxpose.xlu0.b32.cont [4/8] (short) (narrow) %v1600_v60, 8 }
 0x4ef   : > { %1609 = vxpose.xlu0.b32.cont [5/8] (short) (narrow) %v1601_v53, 8 }
 0x4f3   : > { %1610 = vxpose.xlu0.b32.cont [6/8] (short) (narrow) %v1602_v4, 8 }
 0x4f7   : > { %1611 = vxpose.xlu0.b32.cont [7/8] (short) (narrow) %v1603_v0, 8 }
 0x4fb   : > { %1612 = vxpose.xlu0.b32.end [8/8] (short) (narrow) %v1604_v33, 8 }
 0x55f   : > { %v1621_v56 = vpop.trf.xlu0 }
 0x560   : > { %v1637_v35 = vpack.c.bf16 %v1621_v56, %v1621_v56 }
 0x562   : > { %1639 = vst.msk [vmem:[%s188_s10] sm:$0xf] %vm1638_vm9, %v1637_v35 }
 0x563   : > { %1926 = shalt.err (!%p1923_p2)
}
 0x564   : > { %s1927_s5 = scalar_lea.hbm %s2862_s11, 64  ;;  %s1931_s28 = scalar_lea.hbm %s2909_s3, 128 }
 0x565   : > { %p1928_p4 = scmp.ne.s32.totalorder %s2862_s11, %s1927_s5  ;;  %p1932_p9 = scmp.lt.u32.totalorder %s2862_s11, %s2909_s3 }
 0x566   : > { %p1933_p1 = scmp.lt.u32.totalorder %s1931_s28, %s1927_s5  ;;  %p1935_p6 = scmp.lt.u32.totalorder %s1927_s5, %s2862_s11 }
 0x567   : > { %p1929_p5 = pnand %p1928_p4, %p2927_p11 }
 0x568   : > { %p1934_p3 = por %p1933_p1, %p1932_p9 }
 0x569   : > { %p1930_p7 = pneg %p1929_p5 }
 0x56a   : > { %p1936_p12 = por %p1935_p6, %p1934_p3 }
 0x56c   : > { %p1937_p13 = pnand %p1936_p12, %p1930_p7 }
 0x56e   : > { %1940 = shalt.err (!%p1937_p13)
}
 0x56f   : > { %1812 = dma.vmem_to_hbm [thread:$0]  (%p2927_p11), %s2864_s6, 64, %s2862_s11, %s1641_s23  }
 0x570 PF: > { %s1666_s9 = sand.u32 1, %s1967_s12   ;;  %p2928_p8 = scmp.ne.s32.totalorder %s2917_s25, 0 }
 0x571   : > { %p2929_p10 = scmp.ge.s32.totalorder %s1979_s15, 2  ;;  %s1667_s8 = scalar_lea.sflag [#allocation4], %s1666_s9 }
 0x573   : > { %p1819_p0 = pnand %p2929_p10, %p2928_p8 }
 0x575   : > { %1962 = dma.done.wait (!%p1819_p0), %s1667_s8, 64  }
 0x576   : > { %1964 = vsyncadd (!%p1819_p0), %s1667_s8, 4294967232  ;;  %p16_p2 = scmp.ge.s32.totalorder %s2045_s18, 4   ;;  %s2930_s12 = smov %s1971_s13 }
 0x577   : > { %s2931_s13 = smov %s1975_s14  ;;  %s2932_s14 = smov %s2057_s21 }
 0x578   : > { %s2933_s15 = smov %s2045_s18  ;;  %18 = sbr.rel (!%p16_p2) target bundleno = 5 (0x5), region = 77 }
 0x57f   :  { %1672 = vsyncpa [#allocation3], 1 }
 0x580   :  { %1674 = vsyncpa [#allocation3 + $0x1], 1 }
 0x581   :  { %1675 = vsyncpa [#allocation4], 1 }
 0x582   :  { %1677 = vsyncpa [#allocation4 + $0x1], 1 }

</bundles_post_ra>
